<compile_context>
chip_gen: v5e
topology: v5e:2x2
jax: 0.10.0
libtpu: 0.0.40
codegen_flags: <defaults>
</compile_context>

<pallas_src>
import functools

import jax
import jax.numpy as jnp
from jax.experimental import pallas as pl
from jax.experimental.pallas import tpu as pltpu


N_PAD = 128  # lane-dense padded width of the 10-class output layer


def mlp_kernel(x_ref, w1_ref, b1_ref, w2_ref, b2_ref, w3_ref, b3_ref, o_ref):
    # Whole forward pass fused per batch tile. Matmuls take bf16 operands on the
    # MXU with f32 accumulation; bias-add / ReLU stay in f32 on the VPU, and the
    # next dot's LHS is re-cast to bf16.
    x = x_ref[...].astype(jnp.bfloat16)                               # (TB, 784) in-kernel cast
    h1 = jnp.dot(x, w1_ref[...], preferred_element_type=jnp.float32)
    h1 = jnp.maximum(h1 + b1_ref[...], 0.0)                           # (TB, 512) f32
    h2 = jnp.dot(h1.astype(jnp.bfloat16), w2_ref[...],
                 preferred_element_type=jnp.float32)
    h2 = jnp.maximum(h2 + b2_ref[...], 0.0)                           # (TB, 128) f32
    out = jnp.dot(h2.astype(jnp.bfloat16), w3_ref[...],
                  preferred_element_type=jnp.float32)
    o_ref[...] = (out + b3_ref[...]).astype(o_ref.dtype)              # (TB, 128) lane-dense


def prepare_params(params):
    """One-time weight prep (hoisted out of the per-call path).

    Casts w1/w2 to bf16 and pads the 10-wide head to a lane-dense 128 columns
    (zero padding keeps columns 10..127 exactly zero in the output).
    """
    w3_p = jnp.zeros((128, N_PAD), jnp.bfloat16).at[:, :10].set(
        params["w3"].astype(jnp.bfloat16))
    b3_p = jnp.zeros((1, N_PAD), jnp.float32).at[:, :10].set(
        params["b3"].astype(jnp.float32))
    return {
        "w1": params["w1"].astype(jnp.bfloat16),
        "b1": params["b1"].astype(jnp.float32),
        "w2": params["w2"].astype(jnp.bfloat16),
        "b2": params["b2"].astype(jnp.float32),
        "w3": w3_p,
        "b3": b3_p,
    }


def _round_up(n, m):
    return ((n + m - 1) // m) * m


def _pick_batch_tile(B, block_b):
    """Batch-tile selection.

    - If the batch fits in one tile, use a single full-array block (always a
      legal block shape, grid=(1,)).
    - Otherwise use a multiple-of-16 tile (bf16 packs 2 rows per sublane) and,
      when the resulting grid would be odd, nudge the tile so the grid length
      is even (v7x shards the "parallel" axis across its 2 TensorCores; no-op
      cost on v5e/v6e).
    """
    if B <= block_b:
        return B
    tb = max(16, (block_b // 16) * 16)
    n = pl.cdiv(B, tb)
    if n > 1 and n % 2 == 1:
        tb_even = max(16, _round_up(pl.cdiv(B, n + 1), 16))
        if pl.cdiv(B, tb_even) % 2 == 0:
            tb = tb_even
    return tb


@functools.partial(jax.jit, static_argnames=("block_b",))
def mnist_net_forward_padded(x, prepped, block_b=512):
    """Fused MNISTNet forward returning lane-dense padded logits (B, 128).

    Columns 0..9 are the real logits; 10..127 are exactly zero. Consumers on
    the hot path should index columns directly instead of forcing a separate
    un-pad pass.

    x: (B, 784) float32 (cast to bf16 inside the kernel)
    prepped: output of prepare_params()
    """
    w1, b1 = prepped["w1"], prepped["b1"]
    w2, b2 = prepped["w2"], prepped["b2"]
    w3, b3 = prepped["w3"], prepped["b3"]
    B, D_in = x.shape
    assert D_in == 784

    tb = _pick_batch_tile(B, block_b)
    grid = (pl.cdiv(B, tb),)

    def resident(shape):
        # Weights/biases: constant (0, 0) block every grid step -> resident in
        # VMEM; single-buffer them so no VMEM is wasted on a second copy.
        return pl.BlockSpec(shape, lambda i: (0, 0), pipeline_mode=pl.Buffered(1))

    return pl.pallas_call(
        mlp_kernel,
        out_shape=jax.ShapeDtypeStruct((B, N_PAD), jnp.float32),
        grid=grid,
        in_specs=[
            pl.BlockSpec((tb, 784), lambda i: (i, 0)),   # x batch tile (pipelined, f32)
            resident((784, 512)),                        # w1 (bf16)
            resident((1, 512)),                          # b1 (f32)
            resident((512, 128)),                        # w2 (bf16)
            resident((1, 128)),                          # b2 (f32)
            resident((128, N_PAD)),                      # w3 padded (bf16)
            resident((1, N_PAD)),                        # b3 padded (f32)
        ],
        out_specs=pl.BlockSpec((tb, N_PAD), lambda i: (i, 0)),
        compiler_params=pltpu.CompilerParams(
            dimension_semantics=("parallel",),
            vmem_limit_bytes=32 * 1024 * 1024,
        ),
    )(x, w1, b1, w2, b2, w3, b3)


def mnist_net_forward(x, prepped, block_b=512):
    """Exact PyTorch-shaped (B, 10) logits (convenience wrapper; the slice costs
    an extra HBM pass — prefer mnist_net_forward_padded on the hot path)."""
    return mnist_net_forward_padded(x, prepped, block_b=block_b)[:, :10]


def init_params(key):
    """Deterministic init mimicking PyTorch nn.Linear default (U[-1/sqrt(fan_in), +1/sqrt(fan_in)])."""
    def linear(k, fan_in, fan_out):
        kw, kb = jax.random.split(k)
        bound = 1.0 / jnp.sqrt(float(fan_in))
        w = jax.random.uniform(kw, (fan_in, fan_out), jnp.float32, -bound, bound)
        b = jax.random.uniform(kb, (1, fan_out), jnp.float32, -bound, bound)
        return w, b

    k1, k2, k3 = jax.random.split(key, 3)
    w1, b1 = linear(k1, 784, 512)
    w2, b2 = linear(k2, 512, 128)
    w3, b3 = linear(k3, 128, 10)
    return {"w1": w1, "b1": b1, "w2": w2, "b2": b2, "w3": w3, "b3": b3}


def reference_forward(x, p):
    # Pure-JAX reference using the same bf16-inputs / f32-accumulation recipe.
    # (Not bit-identical to a PyTorch f32 MNISTNet: logits differ at ~1e-3.)
    def dot_bf16(a, w):
        return jnp.dot(a.astype(jnp.bfloat16), w.astype(jnp.bfloat16),
                       preferred_element_type=jnp.float32)

    h1 = jnp.maximum(dot_bf16(x, p["w1"]) + p["b1"], 0.0)
    h2 = jnp.maximum(dot_bf16(h1, p["w2"]) + p["b2"], 0.0)
    return dot_bf16(h2, p["w3"]) + p["b3"]


if __name__ == "__main__":
    key = jax.random.PRNGKey(0)
    k_params, k_x = jax.random.split(key)

    params = init_params(k_params)
    prepped = prepare_params(params)

    B = 32  # small demo batch; fits in a single (32, 784) tile -> grid=(1,)
    x = jax.random.normal(k_x, (B, 784), dtype=jnp.float32)

    out_padded = mnist_net_forward_padded(x, prepped)
    out_padded = jax.block_until_ready(out_padded)
    out = out_padded[:, :10]

    ref = reference_forward(x, params)
    assert out_padded.shape == (B, N_PAD)
    assert out.shape == (B, 10)
    assert jnp.allclose(out, ref, atol=2e-3, rtol=2e-3), "mismatch vs pure-JAX reference"
    # Padded columns must stay exactly zero (invariant of the zero-padded head).
    assert jnp.all(out_padded[:, 10:] == 0.0), "padded logit columns not zero"

    print("KERNEL_OK")
</pallas_src>

<mosaic_0001>
module attributes {stable_mosaic.version = 11 : i64} {
  func.func @mlp_kernel(%arg0: i32, %arg1: memref<32x784xf32, #tpu.memory_space<vmem>>, %arg2: memref<784x512xbf16, #tpu.memory_space<vmem>>, %arg3: memref<1x512xf32, #tpu.memory_space<vmem>>, %arg4: memref<512x128xbf16, #tpu.memory_space<vmem>>, %arg5: memref<1x128xf32, #tpu.memory_space<vmem>>, %arg6: memref<128x128xbf16, #tpu.memory_space<vmem>>, %arg7: memref<1x128xf32, #tpu.memory_space<vmem>>, %arg8: memref<32x128xf32, #tpu.memory_space<vmem>>) attributes {dimension_semantics = [#tpu.dimension_semantics<parallel>], iteration_bounds = array<i64: 1>, scalar_prefetch = 0 : i64, scratch_operands = 0 : i64, tpu.core_type = #tpu.core_type<tc>, window_params = [{transform_indices = @transform_0, window_bounds = array<i64: 32, 784>}, {pipeline_mode = #tpu.pipeline_mode<synchronous>, transform_indices = @transform_1, window_bounds = array<i64: 784, 512>}, {pipeline_mode = #tpu.pipeline_mode<synchronous>, transform_indices = @transform_2, window_bounds = array<i64: 1, 512>}, {pipeline_mode = #tpu.pipeline_mode<synchronous>, transform_indices = @transform_3, window_bounds = array<i64: 512, 128>}, {pipeline_mode = #tpu.pipeline_mode<synchronous>, transform_indices = @transform_4, window_bounds = array<i64: 1, 128>}, {pipeline_mode = #tpu.pipeline_mode<synchronous>, transform_indices = @transform_5, window_bounds = array<i64: 128, 128>}, {pipeline_mode = #tpu.pipeline_mode<synchronous>, transform_indices = @transform_6, window_bounds = array<i64: 1, 128>}, {transform_indices = @transform_7, window_bounds = array<i64: 32, 128>}]} {
    %c0 = arith.constant 0 : index
    %c0_0 = arith.constant 0 : index
    %0 = vector.load %arg1[%c0, %c0_0] : memref<32x784xf32, #tpu.memory_space<vmem>>, vector<32x784xf32>
    %1 = arith.truncf %0 : vector<32x784xf32> to vector<32x784xbf16>
    %c0_1 = arith.constant 0 : index
    %c0_2 = arith.constant 0 : index
    %2 = vector.load %arg2[%c0_1, %c0_2] : memref<784x512xbf16, #tpu.memory_space<vmem>>, vector<784x512xbf16>
    %cst = arith.constant dense<0.000000e+00> : vector<32x512xf32>
    %3 = tpu.matmul %1, %2, %cst {dimension_numbers = #tpu.dot_dimension_numbers<[1], [0], [0], [1], [0, 0, 1, 1], [], []>} : vector<32x784xbf16>, vector<784x512xbf16>, vector<32x512xf32> -> vector<32x512xf32>
    %c0_3 = arith.constant 0 : index
    %c0_4 = arith.constant 0 : index
    %4 = vector.load %arg3[%c0_3, %c0_4] : memref<1x512xf32, #tpu.memory_space<vmem>>, vector<1x512xf32>
    %5 = vector.broadcast %4 : vector<1x512xf32> to vector<32x512xf32>
    %6 = arith.addf %3, %5 : vector<32x512xf32>
    %cst_5 = arith.constant 0.000000e+00 : f32
    %7 = vector.broadcast %cst_5 : f32 to vector<32x512xf32>
    %8 = arith.maximumf %6, %7 : vector<32x512xf32>
    %9 = arith.truncf %8 : vector<32x512xf32> to vector<32x512xbf16>
    %c0_6 = arith.constant 0 : index
    %c0_7 = arith.constant 0 : index
    %10 = vector.load %arg4[%c0_6, %c0_7] : memref<512x128xbf16, #tpu.memory_space<vmem>>, vector<512x128xbf16>
    %cst_8 = arith.constant dense<0.000000e+00> : vector<32x128xf32>
    %11 = tpu.matmul %9, %10, %cst_8 {dimension_numbers = #tpu.dot_dimension_numbers<[1], [0], [0], [1], [0, 0, 1, 1], [], []>} : vector<32x512xbf16>, vector<512x128xbf16>, vector<32x128xf32> -> vector<32x128xf32>
    %c0_9 = arith.constant 0 : index
    %c0_10 = arith.constant 0 : index
    %12 = vector.load %arg5[%c0_9, %c0_10] : memref<1x128xf32, #tpu.memory_space<vmem>>, vector<1x128xf32>
    %13 = vector.broadcast %12 : vector<1x128xf32> to vector<32x128xf32>
    %14 = arith.addf %11, %13 : vector<32x128xf32>
    %cst_11 = arith.constant 0.000000e+00 : f32
    %15 = vector.broadcast %cst_11 : f32 to vector<32x128xf32>
    %16 = arith.maximumf %14, %15 : vector<32x128xf32>
    %17 = arith.truncf %16 : vector<32x128xf32> to vector<32x128xbf16>
    %c0_12 = arith.constant 0 : index
    %c0_13 = arith.constant 0 : index
    %18 = vector.load %arg6[%c0_12, %c0_13] : memref<128x128xbf16, #tpu.memory_space<vmem>>, vector<128x128xbf16>
    %cst_14 = arith.constant dense<0.000000e+00> : vector<32x128xf32>
    %19 = tpu.matmul %17, %18, %cst_14 {dimension_numbers = #tpu.dot_dimension_numbers<[1], [0], [0], [1], [0, 0, 1, 1], [], []>} : vector<32x128xbf16>, vector<128x128xbf16>, vector<32x128xf32> -> vector<32x128xf32>
    %c0_15 = arith.constant 0 : index
    %c0_16 = arith.constant 0 : index
    %20 = vector.load %arg7[%c0_15, %c0_16] : memref<1x128xf32, #tpu.memory_space<vmem>>, vector<1x128xf32>
    %21 = vector.broadcast %20 : vector<1x128xf32> to vector<32x128xf32>
    %22 = arith.addf %19, %21 : vector<32x128xf32>
    %c0_17 = arith.constant 0 : index
    %c0_18 = arith.constant 0 : index
    %23 = vector.load %arg8[%c0_17, %c0_18] : memref<32x128xf32, #tpu.memory_space<vmem>>, vector<32x128xf32>
    tpu.vector_store %arg8[%c0_17, %c0_18], %22 {strides = array<i32>} : memref<32x128xf32, #tpu.memory_space<vmem>>, vector<32x128xf32>,
    return
  }
  func.func @transform_0(%arg0: i32) -> (i32, i32) {
    %c0_i32 = arith.constant 0 : i32
    %c0_i32_0 = arith.constant 0 : i32
    return %arg0, %c0_i32 : i32, i32
  }
  func.func @transform_1(%arg0: i32) -> (i32, i32) {
    %c0_i32 = arith.constant 0 : i32
    %c0_i32_0 = arith.constant 0 : i32
    %c0_i32_1 = arith.constant 0 : i32
    return %c0_i32, %c0_i32_0 : i32, i32
  }
  func.func @transform_2(%arg0: i32) -> (i32, i32) {
    %c0_i32 = arith.constant 0 : i32
    %c0_i32_0 = arith.constant 0 : i32
    %c0_i32_1 = arith.constant 0 : i32
    return %c0_i32, %c0_i32_0 : i32, i32
  }
  func.func @transform_3(%arg0: i32) -> (i32, i32) {
    %c0_i32 = arith.constant 0 : i32
    %c0_i32_0 = arith.constant 0 : i32
    %c0_i32_1 = arith.constant 0 : i32
    return %c0_i32, %c0_i32_0 : i32, i32
  }
  func.func @transform_4(%arg0: i32) -> (i32, i32) {
    %c0_i32 = arith.constant 0 : i32
    %c0_i32_0 = arith.constant 0 : i32
    %c0_i32_1 = arith.constant 0 : i32
    return %c0_i32, %c0_i32_0 : i32, i32
  }
  func.func @transform_5(%arg0: i32) -> (i32, i32) {
    %c0_i32 = arith.constant 0 : i32
    %c0_i32_0 = arith.constant 0 : i32
    %c0_i32_1 = arith.constant 0 : i32
    return %c0_i32, %c0_i32_0 : i32, i32
  }
  func.func @transform_6(%arg0: i32) -> (i32, i32) {
    %c0_i32 = arith.constant 0 : i32
    %c0_i32_0 = arith.constant 0 : i32
    %c0_i32_1 = arith.constant 0 : i32
    return %c0_i32, %c0_i32_0 : i32, i32
  }
  func.func @transform_7(%arg0: i32) -> (i32, i32) {
    %c0_i32 = arith.constant 0 : i32
    %c0_i32_0 = arith.constant 0 : i32
    return %arg0, %c0_i32 : i32, i32
  }
}

</mosaic_0001>

<bundles_post_ra>
// kernel: mnist_net_forward_padded.1
= control target key start
LH: loop header
LB: loop body
LE: loop exit
PB: predicated region body
PF: predicated region fallthrough
CT: control target
= control target key end

     0   :  { %12 = vsyncpa [#allocation3], 0  ;;  %s3934_s0 = inlined_call_operand.hbm [shape: f32[32,784], index: 0, kind: input, shape index: {}]   ;;  %s3935_s1 = inlined_call_operand.hbm [shape: bf16[784,512], index: 1, kind: input, shape index: {}]   ;;  %s3936_s2 = inlined_call_operand.hbm [shape: f32[1,512], index: 2, kind: input, shape index: {}]   ;;  %s3937_s3 = inlined_call_operand.hbm [shape: bf16[512,128], index: 3, kind: input, shape index: {}]   ;;  %s3938_s4 = inlined_call_operand.vmem [shape: f32[1,128], index: 4, kind: input, shape index: {}]   ;;  %s3939_s5 = inlined_call_operand.hbm [shape: bf16[128,128], index: 5, kind: input, shape index: {}]   ;;  %s3940_s6 = inlined_call_operand.vmem [shape: f32[1,128], index: 6, kind: input, shape index: {}]   ;;  %s3941_s7 = inlined_call_operand.hbm [shape: f32[32,128], index: 7, kind: output, shape index: {}]  }
   0x1   :  { %13 = vsyncpa [#allocation6], 0 }
   0x2   :  { %14 = vsyncpa [#allocation9], 0  ;;  %s33_s26 = sshll.u32 %s3935_s1, 4  ;;  %s34_s26 = int_to_ptr.hbm [resolvable:$true] %s33_s26 }
   0x3   :  { %15 = vsyncpa [#allocation4], 0  ;;  %s3713_s27 = smov [#allocation5]   ;;  %s57_s8 = sshll.u32 %s3937_s3, 4  ;;  %s58_s8 = int_to_ptr.hbm [resolvable:$true] %s57_s8 }
   0x4   :  { %s35_s28 = sshll.u32 %s3713_s27, 4  ;;  %s3714_s9 = smov 256   ;;  %s36_s28 = int_to_ptr.vmem [resolvable:$true] %s35_s28 }
   0x5   :  { %s3715_s10 = smov 16   ;;  %s3716_s11 = smov [#allocation8]  }
   0x6   :  { %41 = dma.hbm_to_vmem [thread:$0]  %s34_s26, 25088, %s36_s28, [#allocation6], %s3714_s9, %s3714_s9, %s3715_s10  }
   0x7   :  { %s59_s12 = sshll.u32 %s3716_s11, 4  ;;  %s3717_s13 = smov 64   ;;  %s60_s12 = int_to_ptr.vmem [resolvable:$true] %s59_s12 }
   0x8   :  { %s3718_s14 = smov 4   ;;  %s20_s16 = sshll.u32 %s3934_s0, 4  ;;  %s21_s16 = int_to_ptr.hbm [resolvable:$true] %s20_s16 }
   0x9   :  { %65 = dma.hbm_to_vmem [thread:$0]  %s58_s8, 4096, %s60_s12, [#allocation9], %s3717_s13, %s3717_s13, %s3718_s14  }
   0xa   :  { %s3719_s17 = smov [#allocation2]   ;;  %s47_s20 = sshll.u32 %s3936_s2, 4  ;;  %s48_s20 = int_to_ptr.hbm [resolvable:$true] %s47_s20 }
   0xb   :  { %s22_s18 = sshll.u32 %s3719_s17, 4  ;;  %s3720_s21 = smov 896   ;;  %s23_s18 = int_to_ptr.vmem [resolvable:$true] %s22_s18 }
   0xc   :  { %s3721_s22 = smov 56   ;;  %s3722_s23 = smov [#allocation7]  }
   0xd   :  { %28 = dma.hbm_to_vmem [thread:$0]  %s21_s16, 3584, %s23_s18, [#allocation3], %s3720_s21, %s3720_s21, %s3721_s22  }
   0xe   :  { %s49_s24 = sshll.u32 %s3722_s23, 4  ;;  %s72_s27 = sshll.u32 %s3939_s5, 4  ;;  %s50_s24 = int_to_ptr.vmem [resolvable:$true] %s49_s24  ;;  %s73_s27 = int_to_ptr.hbm [resolvable:$true] %s72_s27 }
   0xf   :  { %52 = dma.hbm_to_vmem [thread:$0]  %s48_s20, 64, %s50_s24, [#allocation6]  }
  0x10   :  { %s3723_s0 = smov [#allocation10]  }
  0x11   :  { %s74_s28 = sshll.u32 %s3723_s0, 4  ;;  %s75_s28 = int_to_ptr.vmem [resolvable:$true] %s74_s28 }
  0x12   :  { %80 = dma.hbm_to_vmem [thread:$0]  %s73_s27, 1024, %s75_s28, [#allocation9], %s3717_s13, %s3717_s13, %s3718_s14  }
  0x13   :  { %3705 = dma.done.wait [#allocation3], 3584  }
  0x14   :  { %3706 = vsyncadd [#allocation3], 4294963712 }
  0x15   :  { %3707 = dma.done.wait [#allocation6], 25152  }
  0x16   :  { %3708 = vsyncadd [#allocation6], 4294942144 }
  0x17   :  { %3709 = dma.done.wait [#allocation9], 5120  }
  0x18   :  { %3710 = vsyncadd [#allocation9], 4294962176  ;;  %v2463_v0 = vld [vmem:[#allocation5 + $0xe0] sm:$0xf]  ;;  %v3331_v1 = vld [vmem:[#allocation5 + $0xec] sm:$0xf0] }
  0x19   :  { %v2591_v2 = vld [vmem:[#allocation5 + $0x1e0] sm:$0xf]  ;;  %v2464_v3 = vor.u32 %v3331_v1, %v2463_v0  ;;  %v3363_v4 = vld [vmem:[#allocation5 + $0x1ec] sm:$0xf0]  ;;  %vm1332_vm0 = vcmask 130048   ;;  %s3724_s30 = smov [#allocation11]  }
  0x1a   :  { %v2719_v5 = vld [vmem:[#allocation5 + $0x2e0] sm:$0xf]  ;;  %v3395_v6 = vld [vmem:[#allocation5 + $0x2ec] sm:$0xf0]  ;;  %v2592_v7 = vor.u32 %v3363_v4, %v2591_v2  ;;  %s2332_s8 = sshll.u32 %s3724_s30, 4  ;;  %s2334_s11 = sshll.u32 %s3941_s7, 4  ;;  %s2333_s8 = int_to_ptr.vmem [resolvable:$true] %s2332_s8  ;;  %s2335_s11 = int_to_ptr.hbm [resolvable:$true] %s2334_s11 }
  0x1b   :  { %v2720_v8 = vor.u32 %v3395_v6, %v2719_v5  ;;  %v2847_v9 = vld [vmem:[#allocation5 + $0x3e0] sm:$0xf]  ;;  %v3427_v10 = vld [vmem:[#allocation5 + $0x3ec] sm:$0xf0]  ;;  %1339 = vmatpush.bf16.msra.mxu0 %v2464_v3  ;;  %s3726_s12 = smov 8  }
  0x1c   :  { %v2447_v11 = vld [vmem:[#allocation5 + $0xc0] sm:$0xf]  ;;  %v2848_v12 = vor.u32 %v3427_v10, %v2847_v9  ;;  %v3327_v13 = vld [vmem:[#allocation5 + $0xcc] sm:$0xf0]  ;;  %1358 = vmatpush.bf16.msra.mxu1 %v2592_v7 }
  0x1d   :  { %v2575_v14 = vld [vmem:[#allocation5 + $0x1c0] sm:$0xf]  ;;  %v3359_v15 = vld [vmem:[#allocation5 + $0x1cc] sm:$0xf0]  ;;  %1377 = vmatpush.bf16.msra.mxu2 %v2720_v8  ;;  %v2448_v16 = vor.u32 %v3327_v13, %v2447_v11 }
  0x1e   :  { %v2576_v17 = vor.u32 %v3359_v15, %v2575_v14  ;;  %v2703_v18 = vld [vmem:[#allocation5 + $0x2c0] sm:$0xf]  ;;  %v3391_v19 = vld [vmem:[#allocation5 + $0x2cc] sm:$0xf0]  ;;  %1396 = vmatpush.bf16.msra.mxu3 %v2848_v12 }
  0x1f   :  { %v2831_v20 = vld [vmem:[#allocation5 + $0x3c0] sm:$0xf]  ;;  %v2704_v21 = vor.u32 %v3391_v19, %v2703_v18  ;;  %v3423_v22 = vld [vmem:[#allocation5 + $0x3cc] sm:$0xf0]  ;;  %1340 = vmatpush.bf16.msra.mxu0 %v2448_v16 }
  0x20   :  { %v2431_v23 = vld [vmem:[#allocation5 + $0xa0] sm:$0xf]  ;;  %v3323_v24 = vld [vmem:[#allocation5 + $0xac] sm:$0xf0]  ;;  %v2832_v25 = vor.u32 %v3423_v22, %v2831_v20  ;;  %1359 = vmatpush.bf16.msra.mxu1 %v2576_v17 }
  0x21   :  { %v2559_v26 = vld [vmem:[#allocation5 + $0x1a0] sm:$0xf]  ;;  %v3355_v27 = vld [vmem:[#allocation5 + $0x1ac] sm:$0xf0]  ;;  %v2432_v29 = vor.u32 %v3323_v24, %v2431_v23  ;;  %1378 = vmatpush.bf16.msra.mxu2 %v2704_v21 }
  0x22   :  { %v2687_v28 = vld [vmem:[#allocation5 + $0x2a0] sm:$0xf]  ;;  %v3387_v30 = vld [vmem:[#allocation5 + $0x2ac] sm:$0xf0]  ;;  %v2560_v33 = vor.u32 %v3355_v27, %v2559_v26  ;;  %1397 = vmatpush.bf16.msra.mxu3 %v2832_v25 }
  0x23   :  { %v2815_v31 = vld [vmem:[#allocation5 + $0x3a0] sm:$0xf]  ;;  %v3419_v32 = vld [vmem:[#allocation5 + $0x3ac] sm:$0xf0]  ;;  %v2688_v34 = vor.u32 %v3387_v30, %v2687_v28  ;;  %1341 = vmatpush.bf16.msra.mxu0 %v2432_v29  ;;  %v111_v29 = vld [vmem:[#allocation2 + $0x38] sm:$0xff] }
  0x24   :  { %v2415_v35 = vld [vmem:[#allocation5 + $0x80] sm:$0xf]  ;;  %v3319_v36 = vld [vmem:[#allocation5 + $0x8c] sm:$0xf0]  ;;  %v2816_v38 = vor.u32 %v3419_v32, %v2815_v31  ;;  %1360 = vmatpush.bf16.msra.mxu1 %v2560_v33  ;;  %v105_v30 = vld [vmem:[#allocation2 + $0x8] sm:$0xff] }
  0x25   :  { %v2543_v37 = vld [vmem:[#allocation5 + $0x180] sm:$0xf]  ;;  %v3351_v39 = vld [vmem:[#allocation5 + $0x18c] sm:$0xf0]  ;;  %v2416_v44 = vor.u32 %v3319_v36, %v2415_v35  ;;  %1379 = vmatpush.bf16.msra.mxu2 %v2688_v34 }
  0x26   :  { %v2671_v40 = vld [vmem:[#allocation5 + $0x280] sm:$0xf]  ;;  %v3383_v41 = vld [vmem:[#allocation5 + $0x28c] sm:$0xf0]  ;;  %v2544_v45 = vor.u32 %v3351_v39, %v2543_v37  ;;  %1398 = vmatpush.bf16.msra.mxu3 %v2816_v38 }
  0x27   :  { %v2799_v42 = vld [vmem:[#allocation5 + $0x380] sm:$0xf]  ;;  %v3415_v43 = vld [vmem:[#allocation5 + $0x38c] sm:$0xf0]  ;;  %v2672_v46 = vor.u32 %v3383_v41, %v2671_v40  ;;  %1342 = vmatpush.bf16.msra.mxu0 %v2416_v44  ;;  %v113_v40 = vld [vmem:[#allocation2 + $0x48] sm:$0xff] }
  0x28   :  { %v2399_v47 = vld [vmem:[#allocation5 + $0x60] sm:$0xf]  ;;  %v3315_v48 = vld [vmem:[#allocation5 + $0x6c] sm:$0xf0]  ;;  %v2800_v50 = vor.u32 %v3415_v43, %v2799_v42  ;;  %1361 = vmatpush.bf16.msra.mxu1 %v2544_v45  ;;  %v107_v41 = vld [vmem:[#allocation2 + $0x18] sm:$0xff] }
  0x29   :  { %v2527_v49 = vld [vmem:[#allocation5 + $0x160] sm:$0xf]  ;;  %v3347_v51 = vld [vmem:[#allocation5 + $0x16c] sm:$0xf0]  ;;  %v2400_v56 = vor.u32 %v3315_v48, %v2399_v47  ;;  %1380 = vmatpush.bf16.msra.mxu2 %v2672_v46 }
  0x2a   :  { %v2655_v52 = vld [vmem:[#allocation5 + $0x260] sm:$0xf]  ;;  %v3379_v53 = vld [vmem:[#allocation5 + $0x26c] sm:$0xf0]  ;;  %v2528_v57 = vor.u32 %v3347_v51, %v2527_v49  ;;  %1399 = vmatpush.bf16.msra.mxu3 %v2800_v50  ;;  %v3329_v49 = vld [vmem:[#allocation5 + $0xe4] sm:$0xf] }
  0x2b   :  { %v2783_v54 = vld [vmem:[#allocation5 + $0x360] sm:$0xf]  ;;  %v3411_v55 = vld [vmem:[#allocation5 + $0x36c] sm:$0xf0]  ;;  %v2656_v58 = vor.u32 %v3379_v53, %v2655_v52  ;;  %1343 = vmatpush.bf16.msra.mxu0 %v2400_v56  ;;  %v2465_v50 = vld [vmem:[#allocation5 + $0xf0] sm:$0xf0] }
  0x2c   :  { %v2383_v59 = vld [vmem:[#allocation5 + $0x40] sm:$0xf]  ;;  %v3311_v60 = vld [vmem:[#allocation5 + $0x4c] sm:$0xf0]  ;;  %v2784_v62 = vor.u32 %v3411_v55, %v2783_v54  ;;  %1362 = vmatpush.bf16.msra.mxu1 %v2528_v57  ;;  %v2468_v57 = vor.u32 %v3329_v49, %v2465_v50 }
  0x2d   :  { %v2511_v61 = vld [vmem:[#allocation5 + $0x140] sm:$0xf]  ;;  %v3343_v63 = vld [vmem:[#allocation5 + $0x14c] sm:$0xf0]  ;;  %v2384_v4 = vor.u32 %v3311_v60, %v2383_v59  ;;  %1381 = vmatpush.bf16.msra.mxu2 %v2656_v58 }
  0x2e   :  { %v2639_v0 = vld [vmem:[#allocation5 + $0x240] sm:$0xf]  ;;  %v3375_v1 = vld [vmem:[#allocation5 + $0x24c] sm:$0xf0]  ;;  %v2512_v5 = vor.u32 %v3343_v63, %v2511_v61  ;;  %1400 = vmatpush.bf16.msra.mxu3 %v2784_v62  ;;  %v3325_v61 = vld [vmem:[#allocation5 + $0xc4] sm:$0xf] }
  0x2f   :  { %v2767_v2 = vld [vmem:[#allocation5 + $0x340] sm:$0xf]  ;;  %v3407_v3 = vld [vmem:[#allocation5 + $0x34c] sm:$0xf0]  ;;  %v2640_v6 = vor.u32 %v3375_v1, %v2639_v0  ;;  %1344 = vmatpush.bf16.msra.mxu0 %v2384_v4  ;;  %v2449_v62 = vld [vmem:[#allocation5 + $0xd0] sm:$0xf0] }
  0x30   :  { %v2367_v7 = vld [vmem:[#allocation5 + $0x20] sm:$0xf]  ;;  %v3307_v8 = vld [vmem:[#allocation5 + $0x2c] sm:$0xf0]  ;;  %v2768_v10 = vor.u32 %v3407_v3, %v2767_v2  ;;  %1363 = vmatpush.bf16.msra.mxu1 %v2512_v5  ;;  %v2452_v2 = vor.u32 %v3325_v61, %v2449_v62 }
  0x31   :  { %v2495_v9 = vld [vmem:[#allocation5 + $0x120] sm:$0xf]  ;;  %v3339_v11 = vld [vmem:[#allocation5 + $0x12c] sm:$0xf0]  ;;  %v2368_v17 = vor.u32 %v3307_v8, %v2367_v7  ;;  %1382 = vmatpush.bf16.msra.mxu2 %v2640_v6  ;;  %v3321_v6 = vld [vmem:[#allocation5 + $0xa4] sm:$0xf] }
  0x32   :  { %v2623_v12 = vld [vmem:[#allocation5 + $0x220] sm:$0xf]  ;;  %v3371_v13 = vld [vmem:[#allocation5 + $0x22c] sm:$0xf0]  ;;  %v2496_v21 = vor.u32 %v3339_v11, %v2495_v9  ;;  %1401 = vmatpush.bf16.msra.mxu3 %v2768_v10  ;;  %v2433_v7 = vld [vmem:[#allocation5 + $0xb0] sm:$0xf0] }
  0x33   :  { %v2751_v14 = vld [vmem:[#allocation5 + $0x320] sm:$0xf]  ;;  %v3403_v15 = vld [vmem:[#allocation5 + $0x32c] sm:$0xf0]  ;;  %v2624_v22 = vor.u32 %v3371_v13, %v2623_v12  ;;  %1345 = vmatpush.bf16.msra.mxu0 %v2368_v17  ;;  %v3317_v13 = vld [vmem:[#allocation5 + $0x84] sm:$0xf] }
  0x34   :  { %v2351_v16 = vld [vmem:[#allocation5] sm:$0xf]  ;;  %v3303_v18 = vld [vmem:[#allocation5 + $0xc] sm:$0xf0]  ;;  %v2752_v26 = vor.u32 %v3403_v15, %v2751_v14  ;;  %1364 = vmatpush.bf16.msra.mxu1 %v2496_v21  ;;  %v2436_v14 = vor.u32 %v3321_v6, %v2433_v7  ;;  %v2417_v15 = vld [vmem:[#allocation5 + $0x90] sm:$0xf0] }
  0x35   :  { %v2479_v19 = vld [vmem:[#allocation5 + $0x100] sm:$0xf]  ;;  %v3335_v20 = vld [vmem:[#allocation5 + $0x10c] sm:$0xf0]  ;;  %v2352_v33 = vor.u32 %v3303_v18, %v2351_v16  ;;  %1383 = vmatpush.bf16.msra.mxu2 %v2624_v22  ;;  %v125_v17 = vld [vmem:[#allocation2 + $0xa8] sm:$0xff] }
  0x36   :  { %v2607_v23 = vld [vmem:[#allocation5 + $0x200] sm:$0xf]  ;;  %v3367_v24 = vld [vmem:[#allocation5 + $0x20c] sm:$0xf0]  ;;  %v2480_v37 = vor.u32 %v3335_v20, %v2479_v19  ;;  %1402 = vmatpush.bf16.msra.mxu3 %v2752_v26  ;;  %v119_v19 = vld [vmem:[#allocation2 + $0x78] sm:$0xff] }
  0x37   :  { %v2735_v25 = vld [vmem:[#allocation5 + $0x300] sm:$0xf]  ;;  %v3399_v27 = vld [vmem:[#allocation5 + $0x30c] sm:$0xf0]  ;;  %v2608_v38 = vor.u32 %v3367_v24, %v2607_v23  ;;  %1346 = vmatpush.bf16.msra.mxu0 %v2352_v33  ;;  %v127_v22 = vld [vmem:[#allocation2 + $0xb8] sm:$0xff] }
  0x38   :  { %v104_v28 = vld [vmem:[#allocation2] sm:$0xff]  ;;  %v3495_v32 = vld [vmem:[#allocation5 + $0x60c] sm:$0xf0]  ;;  %v2736_v42 = vor.u32 %v3399_v27, %v2735_v25  ;;  %1365 = vmatpush.bf16.msra.mxu1 %v2480_v37  ;;  %v121_v26 = vld [vmem:[#allocation2 + $0x88] sm:$0xff] }
  0x39   :  { %v3119_v31 = vld [vmem:[#allocation5 + $0x600] sm:$0xf]  ;;  %v3491_v36 = vld [vmem:[#allocation5 + $0x5ec] sm:$0xf0]  ;;  %v3782_v47 = vpack.c.bf16 %v111_v29, %v104_v28  ;;  %1384 = vmatpush.bf16.msra.mxu2 %v2608_v38  ;;  %v2420_v29 = vor.u32 %v3317_v13, %v2417_v15  ;;  %v2801_v6 = vld [vmem:[#allocation5 + $0x390] sm:$0xf0] }
  0x3a   :  { %v112_v34 = vld [vmem:[#allocation2 + $0x40] sm:$0xff]  ;;  %v106_v39 = vld [vmem:[#allocation2 + $0x10] sm:$0xff]  ;;  %v3120_v44 = vor.u32 %v3495_v32, %v3119_v31  ;;  %1403 = vmatpush.bf16.msra.mxu3 %v2736_v42 }
  0x3b   :  { %v3103_v35 = vld [vmem:[#allocation5 + $0x5e0] sm:$0xf]  ;;  %v114_v43 = vld [vmem:[#allocation2 + $0x50] sm:$0xff]  ;;  %v3784_v51 = vpack.c.bf16 %v112_v34, %v105_v30  ;;  %v3786_v52 = vpack.c.bf16 %v113_v40, %v106_v39  ;;  %1347 = vmatmul.bf16.vlgmr.msra.gmra.mxu0 %v3782_v47  ;;  %v3425_v31 = vld [vmem:[#allocation5 + $0x3e4] sm:$0xf] }
  0x3c   :  { %v2975_v45 = vld [vmem:[#allocation5 + $0x4e0] sm:$0xf]  ;;  %v3459_v46 = vld [vmem:[#allocation5 + $0x4ec] sm:$0xf0]  ;;  %v3104_v48 = vor.u32 %v3491_v36, %v3103_v35  ;;  %v3788_v55 = vpack.c.bf16 %v114_v43, %v107_v41  ;;  %v2849_v32 = vld [vmem:[#allocation5 + $0x3f0] sm:$0xf0] }
  0x3d   :  { %v3087_v53 = vld [vmem:[#allocation5 + $0x5c0] sm:$0xf]  ;;  %v3487_v54 = vld [vmem:[#allocation5 + $0x5cc] sm:$0xf0]  ;;  %v2976_v56 = vor.u32 %v3459_v46, %v2975_v45  ;;  %1460 = vmatpush.bf16.msrb.mxu2 %v3120_v44  ;;  %1366 = vmatmul.bf16.vlgmr.msra.gmra.mxu1 %v3784_v51  ;;  %v3313_v35 = vld [vmem:[#allocation5 + $0x64] sm:$0xf]  ;;  %v2852_v37 = vor.u32 %v3425_v31, %v2849_v32 }
  0x3e   :  { %v2959_v58 = vld [vmem:[#allocation5 + $0x4c0] sm:$0xf]  ;;  %v3455_v59 = vld [vmem:[#allocation5 + $0x4cc] sm:$0xf0]  ;;  %1434 = vmatpush.bf16.msrb.mxu1 %v3104_v48  ;;  %v3088_v60 = vor.u32 %v3487_v54, %v3087_v53  ;;  %1385 = vmatmul.bf16.vlgmr.msra.gmra.mxu2 %v3786_v52  ;;  %v2401_v36 = vld [vmem:[#allocation5 + $0x70] sm:$0xf0] }
  0x3f   :  { %v3071_v63 = vld [vmem:[#allocation5 + $0x5a0] sm:$0xf]  ;;  %v3483_v0 = vld [vmem:[#allocation5 + $0x5ac] sm:$0xf0]  ;;  %1404 = vmatmul.bf16.vlgmr.msra.gmra.mxu3 %v3788_v55  ;;  %1415 = vmatpush.bf16.msrb.mxu0 %v2976_v56  ;;  %v2960_v1 = vor.u32 %v3455_v59, %v2959_v58  ;;  %v3421_v44 = vld [vmem:[#allocation5 + $0x3c4] sm:$0xf]  ;;  %v2404_v46 = vor.u32 %v3313_v35, %v2401_v36 }
  0x40   :  { %1472 = vmatpush.bf16.msrb.mxu3 %v2468_v57  ;;  %v2943_v3 = vld [vmem:[#allocation5 + $0x4a0] sm:$0xf]  ;;  %v3451_v4 = vld [vmem:[#allocation5 + $0x4ac] sm:$0xf0]  ;;  %v3072_v5 = vor.u32 %v3483_v0, %v3071_v63  ;;  %v2833_v45 = vld [vmem:[#allocation5 + $0x3d0] sm:$0xf0] }
  0x41   :  { %v3055_v8 = vld [vmem:[#allocation5 + $0x580] sm:$0xf]  ;;  %v3479_v9 = vld [vmem:[#allocation5 + $0x58c] sm:$0xf0]  ;;  %v2944_v10 = vor.u32 %v3451_v4, %v2943_v3  ;;  %1529 = vmatpush.bf16.msra.mxu2 %v2852_v37  ;;  %v2836_v50 = vor.u32 %v3421_v44, %v2833_v45  ;;  %v3309_v54 = vld [vmem:[#allocation5 + $0x44] sm:$0xf] }
  0x42   :  { %1435 = vmatpush.bf16.msrb.mxu1 %v3088_v60  ;;  %v2927_v11 = vld [vmem:[#allocation5 + $0x480] sm:$0xf]  ;;  %v3447_v12 = vld [vmem:[#allocation5 + $0x48c] sm:$0xf0]  ;;  %v3056_v18 = vor.u32 %v3479_v9, %v3055_v8  ;;  %v2385_v56 = vld [vmem:[#allocation5 + $0x50] sm:$0xf0] }
  0x43   :  { %1416 = vmatpush.bf16.msrb.mxu0 %v2960_v1  ;;  %v118_v16 = vld [vmem:[#allocation2 + $0x70] sm:$0xff]  ;;  %v120_v21 = vld [vmem:[#allocation2 + $0x80] sm:$0xff]  ;;  %v2928_v25 = vor.u32 %v3447_v12, %v2927_v11  ;;  %v2388_v62 = vor.u32 %v3309_v54, %v2385_v56 }
  0x44   :  { %1473 = vmatpush.bf16.msrb.mxu3 %v2452_v2  ;;  %v126_v20 = vld [vmem:[#allocation2 + $0xb0] sm:$0xff]  ;;  %v3039_v23 = vld [vmem:[#allocation5 + $0x560] sm:$0xf]  ;;  %v3794_v33 = vpack.c.bf16 %v125_v17, %v118_v16  ;;  %v3798_v39 = vpack.c.bf16 %v127_v22, %v120_v21  ;;  %v3417_v57 = vld [vmem:[#allocation5 + $0x3a4] sm:$0xf] }
  0x45   :  { %v3475_v24 = vld [vmem:[#allocation5 + $0x56c] sm:$0xf0]  ;;  %v128_v27 = vld [vmem:[#allocation2 + $0xc0] sm:$0xff]  ;;  %v3796_v38 = vpack.c.bf16 %v126_v20, %v119_v19  ;;  %v2817_v60 = vld [vmem:[#allocation5 + $0x3b0] sm:$0xf0]  ;;  %1530 = vmatpush.bf16.msra.mxu2 %v2836_v50 }
  0x46   :  { %1436 = vmatpush.bf16.msrb.mxu1 %v3072_v5  ;;  %v2911_v28 = vld [vmem:[#allocation5 + $0x460] sm:$0xf]  ;;  %v3443_v30 = vld [vmem:[#allocation5 + $0x46c] sm:$0xf0]  ;;  %v3040_v34 = vor.u32 %v3475_v24, %v3039_v23  ;;  %v3800_v42 = vpack.c.bf16 %v128_v27, %v121_v26  ;;  %v3305_v1 = vld [vmem:[#allocation5 + $0x24] sm:$0xf]  ;;  %v2820_v2 = vor.u32 %v3417_v57, %v2817_v60 }
  0x47   :  { %1417 = vmatpush.bf16.msrb.mxu0 %v2944_v10  ;;  %v3023_v40 = vld [vmem:[#allocation5 + $0x540] sm:$0xf]  ;;  %v3471_v41 = vld [vmem:[#allocation5 + $0x54c] sm:$0xf0]  ;;  %v2912_v43 = vor.u32 %v3443_v30, %v2911_v28  ;;  %v2369_v4 = vld [vmem:[#allocation5 + $0x30] sm:$0xf0] }
  0x48   :  { %1474 = vmatpush.bf16.msrb.mxu3 %v2436_v14  ;;  %v2895_v48 = vld [vmem:[#allocation5 + $0x440] sm:$0xf]  ;;  %v3439_v49 = vld [vmem:[#allocation5 + $0x44c] sm:$0xf0]  ;;  %v3024_v53 = vor.u32 %v3471_v41, %v3023_v40  ;;  %v3413_v5 = vld [vmem:[#allocation5 + $0x384] sm:$0xf]  ;;  %v2372_v13 = vor.u32 %v3305_v1, %v2369_v4 }
  0x49   :  { %v3007_v58 = vld [vmem:[#allocation5 + $0x520] sm:$0xf]  ;;  %v3467_v59 = vld [vmem:[#allocation5 + $0x52c] sm:$0xf0]  ;;  %v2896_v61 = vor.u32 %v3439_v49, %v2895_v48  ;;  %v3393_v11 = vld [vmem:[#allocation5 + $0x2e4] sm:$0xf]  ;;  %1531 = vmatpush.bf16.msra.mxu2 %v2820_v2  ;;  %v2804_v17 = vor.u32 %v3413_v5, %v2801_v6 }
  0x4a   :  { %1437 = vmatpush.bf16.msrb.mxu1 %v3056_v18  ;;  %v2879_v63 = vld [vmem:[#allocation5 + $0x420] sm:$0xf]  ;;  %v3435_v0 = vld [vmem:[#allocation5 + $0x42c] sm:$0xf0]  ;;  %v3008_v3 = vor.u32 %v3467_v59, %v3007_v58  ;;  %v2721_v12 = vld [vmem:[#allocation5 + $0x2f0] sm:$0xf0] }
  0x4b   :  { %1418 = vmatpush.bf16.msrb.mxu0 %v2928_v25  ;;  %v2991_v7 = vld [vmem:[#allocation5 + $0x500] sm:$0xf]  ;;  %v3463_v8 = vld [vmem:[#allocation5 + $0x50c] sm:$0xf0]  ;;  %v2880_v9 = vor.u32 %v3435_v0, %v2879_v63  ;;  %v3301_v15 = vld [vmem:[#allocation5 + $0x4] sm:$0xf]  ;;  %v2724_v24 = vor.u32 %v3393_v11, %v2721_v12 }
  0x4c   :  { %1475 = vmatpush.bf16.msrb.mxu3 %v2420_v29  ;;  %1352 = vmatmul.bf16.gmra.mxu0 %v3794_v33  ;;  %v2863_v10 = vld [vmem:[#allocation5 + $0x400] sm:$0xf]  ;;  %v3431_v14 = vld [vmem:[#allocation5 + $0x40c] sm:$0xf0]  ;;  %v2353_v16 = vld [vmem:[#allocation5 + $0x10] sm:$0xf0]  ;;  %v2992_v18 = vor.u32 %v3463_v8, %v2991_v7 }
  0x4d   :  { %1371 = vmatmul.bf16.gmra.mxu1 %v3796_v38  ;;  %v108_v19 = vld [vmem:[#allocation2 + $0x20] sm:$0xff]  ;;  %v115_v20 = vld [vmem:[#allocation2 + $0x58] sm:$0xff]  ;;  %v2593_v22 = vld [vmem:[#allocation5 + $0x1f0] sm:$0xf0]  ;;  %v2864_v28 = vor.u32 %v3431_v14, %v2863_v10  ;;  %v2356_v32 = vor.u32 %v3301_v15, %v2353_v16  ;;  %1532 = vmatpush.bf16.msra.mxu2 %v2804_v17 }
  0x4e   :  { %1438 = vmatpush.bf16.msrb.mxu1 %v3040_v34  ;;  %1390 = vmatmul.bf16.gmra.mxu2 %v3798_v39  ;;  %v3361_v21 = vld [vmem:[#allocation5 + $0x1e4] sm:$0xf]  ;;  %v2977_v25 = vld [vmem:[#allocation5 + $0x4f0] sm:$0xf0]  ;;  %v109_v29 = vld [vmem:[#allocation2 + $0x28] sm:$0xff] }
  0x4f   :  { %1409 = vmatmul.bf16.gmra.mxu3 %v3800_v42  ;;  %1419 = vmatpush.bf16.msrb.mxu0 %v2912_v43  ;;  %v3457_v23 = vld [vmem:[#allocation5 + $0x4e4] sm:$0xf]  ;;  %v2785_v27 = vld [vmem:[#allocation5 + $0x370] sm:$0xf0]  ;;  %v117_v34 = vld [vmem:[#allocation2 + $0x68] sm:$0xff]  ;;  %v2596_v35 = vor.u32 %v3361_v21, %v2593_v22 }
  0x50   :  { %1476 = vmatpush.bf16.msrb.mxu3 %v2404_v46  ;;  %v3409_v26 = vld [vmem:[#allocation5 + $0x364] sm:$0xf]  ;;  %v110_v31 = vld [vmem:[#allocation2 + $0x30] sm:$0xff]  ;;  %v2980_v40 = vor.u32 %v3457_v23, %v2977_v25  ;;  %v3806_v46 = vpack.c.bf16 %v115_v20, %v108_v19  ;;  %v2471_v16 = vld [vmem:[#allocation5 + $0xe8] sm:$0xf] }
  0x51   :  { %v116_v30 = vld [vmem:[#allocation2 + $0x60] sm:$0xff]  ;;  %v2577_v37 = vld [vmem:[#allocation5 + $0x1d0] sm:$0xf0]  ;;  %v2788_v45 = vor.u32 %v3409_v26, %v2785_v27  ;;  %v3810_v54 = vpack.c.bf16 %v117_v34, %v110_v31  ;;  %v3332_v17 = vld [vmem:[#allocation5 + $0xf4] sm:$0xf0] }
  0x52   :  { %1439 = vmatpush.bf16.msrb.mxu1 %v3024_v53  ;;  %v3357_v36 = vld [vmem:[#allocation5 + $0x1c4] sm:$0xf]  ;;  %v2705_v43 = vld [vmem:[#allocation5 + $0x2d0] sm:$0xf0]  ;;  %v3808_v48 = vpack.c.bf16 %v116_v30, %v109_v29  ;;  %v129_v23 = vld [vmem:[#allocation2 + $0xc8] sm:$0xff] }
  0x53   :  { %1420 = vmatpush.bf16.msrb.mxu0 %v2896_v61  ;;  %v3389_v41 = vld [vmem:[#allocation5 + $0x2c4] sm:$0xf]  ;;  %v2961_v49 = vld [vmem:[#allocation5 + $0x4d0] sm:$0xf0]  ;;  %v2580_v56 = vor.u32 %v3357_v36, %v2577_v37  ;;  %1533 = vmatpush.bf16.msra.mxu2 %v2788_v45 }
  0x54   :  { %1477 = vmatpush.bf16.msrb.mxu3 %v2388_v62  ;;  %v3453_v44 = vld [vmem:[#allocation5 + $0x4c4] sm:$0xf]  ;;  %v2769_v53 = vld [vmem:[#allocation5 + $0x350] sm:$0xf0]  ;;  %v2708_v57 = vor.u32 %v3389_v41, %v2705_v43 }
  0x55   :  { %v3405_v50 = vld [vmem:[#allocation5 + $0x344] sm:$0xf]  ;;  %v2561_v59 = vld [vmem:[#allocation5 + $0x1b0] sm:$0xf0]  ;;  %v2964_v60 = vor.u32 %v3453_v44, %v2961_v49 }
  0x56   :  { %1440 = vmatpush.bf16.msrb.mxu1 %v3008_v3  ;;  %v3353_v58 = vld [vmem:[#allocation5 + $0x1a4] sm:$0xf]  ;;  %v2689_v62 = vld [vmem:[#allocation5 + $0x2b0] sm:$0xf0]  ;;  %v2772_v0 = vor.u32 %v3405_v50, %v2769_v53 }
  0x57   :  { %1421 = vmatpush.bf16.msrb.mxu0 %v2880_v9  ;;  %v3385_v61 = vld [vmem:[#allocation5 + $0x2a4] sm:$0xf]  ;;  %v2945_v1 = vld [vmem:[#allocation5 + $0x4b0] sm:$0xf0]  ;;  %v2564_v4 = vor.u32 %v3353_v58, %v2561_v59  ;;  %v3328_v58 = vld [vmem:[#allocation5 + $0xd4] sm:$0xf0] }
  0x58   :  { %1478 = vmatpush.bf16.msrb.mxu3 %v2372_v13  ;;  %v3449_v63 = vld [vmem:[#allocation5 + $0x4a4] sm:$0xf]  ;;  %v2753_v3 = vld [vmem:[#allocation5 + $0x330] sm:$0xf0]  ;;  %v2692_v5 = vor.u32 %v3385_v61, %v2689_v62  ;;  %1534 = vmatpush.bf16.msra.mxu2 %v2772_v0 }
  0x59   :  { %v3401_v2 = vld [vmem:[#allocation5 + $0x324] sm:$0xf]  ;;  %v2545_v7 = vld [vmem:[#allocation5 + $0x190] sm:$0xf0]  ;;  %v2948_v8 = vor.u32 %v3449_v63, %v2945_v1 }
  0x5a   :  { %1441 = vmatpush.bf16.msrb.mxu1 %v2992_v18  ;;  %v3349_v6 = vld [vmem:[#allocation5 + $0x184] sm:$0xf]  ;;  %v2673_v10 = vld [vmem:[#allocation5 + $0x290] sm:$0xf0]  ;;  %v2756_v12 = vor.u32 %v3401_v2, %v2753_v3 }
  0x5b   :  { %1422 = vmatpush.bf16.msrb.mxu0 %v2864_v28  ;;  %v3381_v9 = vld [vmem:[#allocation5 + $0x284] sm:$0xf]  ;;  %v2929_v13 = vld [vmem:[#allocation5 + $0x490] sm:$0xf0]  ;;  %v2548_v18 = vor.u32 %v3349_v6, %v2545_v7  ;;  %v2439_v6 = vld [vmem:[#allocation5 + $0xa8] sm:$0xf] }
  0x5c   :  { %1479 = vmatpush.bf16.msrb.mxu3 %v2356_v32  ;;  %v3445_v11 = vld [vmem:[#allocation5 + $0x484] sm:$0xf]  ;;  %v2737_v15 = vld [vmem:[#allocation5 + $0x310] sm:$0xf0]  ;;  %v2676_v19 = vor.u32 %v3381_v9, %v2673_v10  ;;  %1535 = vmatpush.bf16.msra.mxu2 %v2756_v12  ;;  %v2472_v32 = vor.u32 %v3332_v17, %v2471_v16  ;;  %v3324_v7 = vld [vmem:[#allocation5 + $0xb4] sm:$0xf0] }
  0x5d   :  { %1442 = vmatmul.bf16.vlgmr.msrb.gmra.mxu1 %v3808_v48  ;;  %v3397_v14 = vld [vmem:[#allocation5 + $0x304] sm:$0xf]  ;;  %v2932_v21 = vor.u32 %v3445_v11, %v2929_v13  ;;  %v122_v22 = vld [vmem:[#allocation2 + $0x90] sm:$0xff]  ;;  %v2440_v17 = vor.u32 %v3324_v7, %v2439_v6  ;;  %v3352_v6 = vld [vmem:[#allocation5 + $0x194] sm:$0xf0] }
  0x5e   :  { %1510 = vmatpush.bf16.msra.mxu1 %v2724_v24  ;;  %1423 = vmatmul.bf16.vlgmr.msrb.gmra.mxu0 %v3806_v46  ;;  %v3345_v20 = vld [vmem:[#allocation5 + $0x164] sm:$0xf]  ;;  %v123_v24 = vld [vmem:[#allocation2 + $0x98] sm:$0xff]  ;;  %v2529_v25 = vld [vmem:[#allocation5 + $0x170] sm:$0xf0]  ;;  %v2740_v28 = vor.u32 %v3397_v14, %v2737_v15  ;;  %v3817_v50 = vpack.c.bf16 %v129_v23, %v122_v22 }
  0x5f   :  { %1491 = vmatpush.bf16.msra.mxu0 %v2596_v35  ;;  %3133 = vmatmul.msk.bf16.vlgmr.msrb.gmra.mxu2 %vm1332_vm0, %v3810_v54  ;;  %v3377_v26 = vld [vmem:[#allocation5 + $0x264] sm:$0xf]  ;;  %v2657_v27 = vld [vmem:[#allocation5 + $0x270] sm:$0xf0]  ;;  %v131_v35 = vld [vmem:[#allocation2 + $0xd8] sm:$0xff]  ;;  %v2532_v37 = vor.u32 %v3345_v20, %v2529_v25 }
  0x60   :  { %1548 = vmatpush.bf16.msra.mxu3 %v2980_v40  ;;  %v130_v29 = vld [vmem:[#allocation2 + $0xd0] sm:$0xff]  ;;  %v3441_v30 = vld [vmem:[#allocation5 + $0x464] sm:$0xf]  ;;  %v2660_v40 = vor.u32 %v3377_v26, %v2657_v27  ;;  %1536 = vmatpush.bf16.msra.mxu2 %v2740_v28  ;;  %v2599_v20 = vld [vmem:[#allocation5 + $0x1e8] sm:$0xf] }
  0x61   :  { %1480 = vmatmul.bf16.vlgmr.msrb.gmra.mxu3 %v3782_v47  ;;  %v2913_v31 = vld [vmem:[#allocation5 + $0x470] sm:$0xf0]  ;;  %v124_v34 = vld [vmem:[#allocation2 + $0xa0] sm:$0xff]  ;;  %v3819_v53 = vpack.c.bf16 %v130_v29, %v123_v24  ;;  %v2423_v26 = vld [vmem:[#allocation5 + $0x88] sm:$0xf] }
  0x62   :  { %1511 = vmatpush.bf16.msra.mxu1 %v2708_v57  ;;  %v3341_v36 = vld [vmem:[#allocation5 + $0x144] sm:$0xf]  ;;  %v2513_v41 = vld [vmem:[#allocation5 + $0x150] sm:$0xf0]  ;;  %v2916_v43 = vor.u32 %v3441_v30, %v2913_v31  ;;  %v2455_v57 = vld [vmem:[#allocation5 + $0xc8] sm:$0xf]  ;;  %v3821_v59 = vpack.c.bf16 %v131_v35, %v124_v34 }
  0x63   :  { %1492 = vmatpush.bf16.msra.mxu0 %v2580_v56  ;;  %v3373_v44 = vld [vmem:[#allocation5 + $0x244] sm:$0xf]  ;;  %v2641_v45 = vld [vmem:[#allocation5 + $0x250] sm:$0xf0]  ;;  %v3320_v27 = vld [vmem:[#allocation5 + $0x94] sm:$0xf0] }
  0x64   :  { %1549 = vmatpush.bf16.msra.mxu3 %v2964_v60  ;;  %v3437_v49 = vld [vmem:[#allocation5 + $0x444] sm:$0xf]  ;;  %v2897_v56 = vld [vmem:[#allocation5 + $0x450] sm:$0xf0]  ;;  %1605 = vmatpush.bf16.msrb.mxu2 %v2472_v32  ;;  %v2516_v60 = vor.u32 %v3341_v36, %v2513_v41  ;;  %v2644_v61 = vor.u32 %v3373_v44, %v2641_v45  ;;  %v2424_v35 = vor.u32 %v3320_v27, %v2423_v26  ;;  %v2583_v36 = vld [vmem:[#allocation5 + $0x1c8] sm:$0xf] }
  0x65   :  { %v3337_v62 = vld [vmem:[#allocation5 + $0x124] sm:$0xf]  ;;  %v2497_v63 = vld [vmem:[#allocation5 + $0x130] sm:$0xf0]  ;;  %v2900_v0 = vor.u32 %v3437_v49, %v2897_v56  ;;  %v2407_v41 = vld [vmem:[#allocation5 + $0x68] sm:$0xf] }
  0x66   :  { %1512 = vmatpush.bf16.msra.mxu1 %v2692_v5  ;;  %v3369_v1 = vld [vmem:[#allocation5 + $0x224] sm:$0xf]  ;;  %v2625_v2 = vld [vmem:[#allocation5 + $0x230] sm:$0xf0]  ;;  %v2567_v56 = vld [vmem:[#allocation5 + $0x1a8] sm:$0xf] }
  0x67   :  { %1493 = vmatpush.bf16.msra.mxu0 %v2564_v4  ;;  %v3433_v3 = vld [vmem:[#allocation5 + $0x424] sm:$0xf]  ;;  %v2456_v4 = vor.u32 %v3328_v58, %v2455_v57  ;;  %v2881_v5 = vld [vmem:[#allocation5 + $0x430] sm:$0xf0]  ;;  %v2628_v9 = vor.u32 %v3369_v1, %v2625_v2  ;;  %v3356_v57 = vld [vmem:[#allocation5 + $0x1b4] sm:$0xf0] }
  0x68   :  { %1550 = vmatpush.bf16.msra.mxu3 %v2948_v8  ;;  %v2500_v8 = vor.u32 %v3337_v62, %v2497_v63  ;;  %v3333_v10 = vld [vmem:[#allocation5 + $0x104] sm:$0xf]  ;;  %v2481_v11 = vld [vmem:[#allocation5 + $0x110] sm:$0xf0]  ;;  %v2884_v13 = vor.u32 %v3433_v3, %v2881_v5  ;;  %v2391_v62 = vld [vmem:[#allocation5 + $0x48] sm:$0xf] }
  0x69   :  { %v3365_v12 = vld [vmem:[#allocation5 + $0x204] sm:$0xf]  ;;  %v2609_v14 = vld [vmem:[#allocation5 + $0x210] sm:$0xf0]  ;;  %1606 = vmatpush.bf16.msrb.mxu2 %v2456_v4  ;;  %v2484_v24 = vor.u32 %v3333_v10, %v2481_v11  ;;  %v3312_v63 = vld [vmem:[#allocation5 + $0x54] sm:$0xf0]  ;;  %v2568_v4 = vor.u32 %v3356_v57, %v2567_v56 }
  0x6a   :  { %1513 = vmatpush.bf16.msra.mxu1 %v2676_v19  ;;  %v3429_v15 = vld [vmem:[#allocation5 + $0x404] sm:$0xf]  ;;  %v2865_v16 = vld [vmem:[#allocation5 + $0x410] sm:$0xf0]  ;;  %v2612_v25 = vor.u32 %v3365_v12, %v2609_v14  ;;  %v2855_v1 = vld [vmem:[#allocation5 + $0x3e8] sm:$0xf]  ;;  %v2392_v7 = vor.u32 %v3312_v63, %v2391_v62 }
  0x6b   :  { %1494 = vmatpush.bf16.msra.mxu0 %v2548_v18  ;;  %v3489_v18 = vld [vmem:[#allocation5 + $0x5e4] sm:$0xf]  ;;  %v3105_v19 = vld [vmem:[#allocation5 + $0x5f0] sm:$0xf0]  ;;  %v2868_v28 = vor.u32 %v3429_v15, %v2865_v16  ;;  %v3428_v2 = vld [vmem:[#allocation5 + $0x3f4] sm:$0xf0] }
  0x6c   :  { %1551 = vmatpush.bf16.msra.mxu3 %v2932_v21  ;;  %v3364_v21 = vld [vmem:[#allocation5 + $0x1f4] sm:$0xf0]  ;;  %v3493_v22 = vld [vmem:[#allocation5 + $0x604] sm:$0xf]  ;;  %v3121_v23 = vld [vmem:[#allocation5 + $0x610] sm:$0xf0]  ;;  %v3108_v29 = vor.u32 %v3489_v18, %v3105_v19  ;;  %v2856_v3 = vor.u32 %v3428_v2, %v2855_v1 }
  0x6d   :  { %1447 = vmatmul.bf16.gmra.mxu1 %v3819_v53  ;;  %1607 = vmatpush.bf16.msrb.mxu2 %v2440_v17  ;;  %v2600_v30 = vor.u32 %v3364_v21, %v2599_v20  ;;  %v3124_v31 = vor.u32 %v3493_v22, %v3121_v23  ;;  %v3485_v32 = vld [vmem:[#allocation5 + $0x5c4] sm:$0xf]  ;;  %v3089_v34 = vld [vmem:[#allocation5 + $0x5d0] sm:$0xf0]  ;;  %v2551_v5 = vld [vmem:[#allocation5 + $0x188] sm:$0xf] }
  0x6e   :  { %1514 = vmatpush.bf16.msra.mxu1 %v2660_v40  ;;  %1428 = vmatmul.bf16.gmra.mxu0 %v3817_v50  ;;  %v3360_v40 = vld [vmem:[#allocation5 + $0x1d4] sm:$0xf0]  ;;  %v3481_v44 = vld [vmem:[#allocation5 + $0x5a4] sm:$0xf]  ;;  %v3073_v45 = vld [vmem:[#allocation5 + $0x5b0] sm:$0xf0]  ;;  %v2552_v17 = vor.u32 %v3352_v6, %v2551_v5 }
  0x6f   :  { %1495 = vmatpush.bf16.msra.mxu0 %v2532_v37  ;;  %3134 = vmatmul.msk.bf16.gmra.mxu2 %vm1332_vm0, %v3821_v59  ;;  %v3092_v37 = vor.u32 %v3485_v32, %v3089_v34  ;;  %v2584_v49 = vor.u32 %v3360_v40, %v2583_v36  ;;  %v3308_v10 = vld [vmem:[#allocation5 + $0x34] sm:$0xf0]  ;;  %v2839_v11 = vld [vmem:[#allocation5 + $0x3c8] sm:$0xf]  ;;  %v3041_v14 = vld [vmem:[#allocation5 + $0x570] sm:$0xf0] }
  0x70   :  { %1552 = vmatpush.bf16.msra.mxu3 %v2916_v43  ;;  %v3316_v43 = vld [vmem:[#allocation5 + $0x74] sm:$0xf0]  ;;  %v2823_v16 = vld [vmem:[#allocation5 + $0x3a8] sm:$0xf]  ;;  %v3469_v23 = vld [vmem:[#allocation5 + $0x544] sm:$0xf] }
  0x71   :  { %1485 = vmatmul.bf16.gmra.mxu3 %v3794_v33  ;;  %1608 = vmatpush.bf16.msrb.mxu2 %v2424_v35  ;;  %v2408_v58 = vor.u32 %v3316_v43, %v2407_v41  ;;  %v3424_v12 = vld [vmem:[#allocation5 + $0x3d4] sm:$0xf0]  ;;  %v2535_v18 = vld [vmem:[#allocation5 + $0x168] sm:$0xf]  ;;  %v3025_v27 = vld [vmem:[#allocation5 + $0x550] sm:$0xf0] }
  0x72   :  { %1515 = vmatpush.bf16.msra.mxu1 %v2644_v61  ;;  %v3477_v61 = vld [vmem:[#allocation5 + $0x584] sm:$0xf]  ;;  %v2840_v15 = vor.u32 %v3424_v12, %v2839_v11  ;;  %v3348_v19 = vld [vmem:[#allocation5 + $0x174] sm:$0xf0]  ;;  %v3028_v35 = vor.u32 %v3469_v23, %v3025_v27  ;;  %v2807_v40 = vld [vmem:[#allocation5 + $0x388] sm:$0xf] }
  0x73   :  { %1496 = vmatpush.bf16.msra.mxu0 %v2516_v60  ;;  %v3076_v60 = vor.u32 %v3481_v44, %v3073_v45  ;;  %v3420_v21 = vld [vmem:[#allocation5 + $0x3b4] sm:$0xf0]  ;;  %v3465_v36 = vld [vmem:[#allocation5 + $0x524] sm:$0xf]  ;;  %v3009_v43 = vld [vmem:[#allocation5 + $0x530] sm:$0xf0] }
  0x74   :  { %1553 = vmatpush.bf16.msra.mxu3 %v2900_v0  ;;  %v3057_v0 = vld [vmem:[#allocation5 + $0x590] sm:$0xf0]  ;;  %v2824_v26 = vor.u32 %v3420_v21, %v2823_v16  ;;  %v3344_v32 = vld [vmem:[#allocation5 + $0x154] sm:$0xf0]  ;;  %v2967_v44 = vld [vmem:[#allocation5 + $0x4c8] sm:$0xf] }
  0x75   :  { %1609 = vmatpush.bf16.msrb.mxu2 %v2408_v58  ;;  %v3416_v41 = vld [vmem:[#allocation5 + $0x394] sm:$0xf0]  ;;  %v2503_v56 = vld [vmem:[#allocation5 + $0x128] sm:$0xf]  ;;  %v2993_v62 = vld [vmem:[#allocation5 + $0x510] sm:$0xf0] }
  0x76   :  { %1516 = vmatpush.bf16.msra.mxu1 %v2628_v9  ;;  %v3060_v9 = vor.u32 %v3477_v61, %v3057_v0  ;;  %v3456_v45 = vld [vmem:[#allocation5 + $0x4d4] sm:$0xf0]  ;;  %v2808_v58 = vor.u32 %v3416_v41, %v2807_v40  ;;  %v3461_v61 = vld [vmem:[#allocation5 + $0x504] sm:$0xf]  ;;  %v2951_v0 = vld [vmem:[#allocation5 + $0x4a8] sm:$0xf] }
  0x77   :  { %1497 = vmatpush.bf16.msra.mxu0 %v2500_v8  ;;  %v2375_v8 = vld [vmem:[#allocation5 + $0x28] sm:$0xf]  ;;  %v3340_v57 = vld [vmem:[#allocation5 + $0x134] sm:$0xf0]  ;;  %v2968_v63 = vor.u32 %v3456_v45, %v2967_v44 }
  0x78   :  { %1554 = vmatpush.bf16.msra.mxu3 %v2884_v13  ;;  %v3473_v13 = vld [vmem:[#allocation5 + $0x564] sm:$0xf]  ;;  %v2376_v20 = vor.u32 %v3308_v10, %v2375_v8  ;;  %v3452_v1 = vld [vmem:[#allocation5 + $0x4b4] sm:$0xf0]  ;;  %v2791_v2 = vld [vmem:[#allocation5 + $0x368] sm:$0xf]  ;;  %v2504_v6 = vor.u32 %v3340_v57, %v2503_v56  ;;  %v2996_v10 = vor.u32 %v3461_v61, %v2993_v62 }
  0x79   :  { %1610 = vmatpush.bf16.msrb.mxu2 %v2392_v7  ;;  %v3044_v22 = vor.u32 %v3473_v13, %v3041_v14  ;;  %v3396_v5 = vld [vmem:[#allocation5 + $0x2f4] sm:$0xf0]  ;;  %v2487_v7 = vld [vmem:[#allocation5 + $0x108] sm:$0xf]  ;;  %v2952_v12 = vor.u32 %v3452_v1, %v2951_v0  ;;  %v3330_v1 = vld [vmem:[#allocation5 + $0xec] sm:$0xf] }
  0x7a   :  { %1517 = vmatpush.bf16.msra.mxu1 %v2612_v25  ;;  %v3304_v25 = vld [vmem:[#allocation5 + $0x14] sm:$0xf0]  ;;  %v3111_v11 = vld [vmem:[#allocation5 + $0x5e8] sm:$0xf] }
  0x7b   :  { %1498 = vmatpush.bf16.msra.mxu0 %v2484_v24  ;;  %v2359_v24 = vld [vmem:[#allocation5 + $0x8] sm:$0xf]  ;;  %v3336_v8 = vld [vmem:[#allocation5 + $0x114] sm:$0xf0] }
  0x7c   :  { %1555 = vmatpush.bf16.msra.mxu3 %v2868_v28  ;;  %v2983_v28 = vld [vmem:[#allocation5 + $0x4e8] sm:$0xf]  ;;  %v2360_v34 = vor.u32 %v3304_v25, %v2359_v24  ;;  %v3408_v14 = vld [vmem:[#allocation5 + $0x354] sm:$0xf0]  ;;  %v2488_v21 = vor.u32 %v3336_v8, %v2487_v7 }
  0x7d   :  { %1518 = vmatmul.bf16.vlgmr.msra.gmra.mxu1 %v3786_v52  ;;  %1611 = vmatpush.bf16.msrb.mxu2 %v2376_v20  ;;  %v2775_v13 = vld [vmem:[#allocation5 + $0x348] sm:$0xf]  ;;  %v3492_v16 = vld [vmem:[#allocation5 + $0x5f4] sm:$0xf0] }
  0x7e   :  { %1593 = vmatpush.bf16.msrb.mxu1 %v3124_v31  ;;  %1499 = vmatmul.bf16.vlgmr.msra.gmra.mxu0 %v3784_v51  ;;  %v2519_v31 = vld [vmem:[#allocation5 + $0x148] sm:$0xf]  ;;  %v3392_v20 = vld [vmem:[#allocation5 + $0x2d4] sm:$0xf0]  ;;  %v3112_v23 = vor.u32 %v3492_v16, %v3111_v11  ;;  %v2457_v16 = vld [vmem:[#allocation5 + $0xd8] sm:$0xf0] }
  0x7f   :  { %1567 = vmatpush.bf16.msrb.mxu0 %v3108_v29  ;;  %1537 = vmatmul.bf16.vlgmr.msra.gmra.mxu2 %v3788_v55  ;;  %v3460_v29 = vld [vmem:[#allocation5 + $0x4f4] sm:$0xf0]  ;;  %v3095_v24 = vld [vmem:[#allocation5 + $0x5c8] sm:$0xf] }
  0x80   :  { %1624 = vmatpush.bf16.msrb.mxu3 %v2600_v30  ;;  %v2536_v30 = vor.u32 %v3348_v19, %v2535_v18  ;;  %v3448_v18 = vld [vmem:[#allocation5 + $0x494] sm:$0xf0]  ;;  %v2711_v19 = vld [vmem:[#allocation5 + $0x2c8] sm:$0xf] }
  0x81   :  { %1556 = vmatmul.bf16.vlgmr.msra.gmra.mxu3 %v3806_v46  ;;  %1612 = vmatpush.bf16.msrb.mxu2 %v2360_v34  ;;  %v3404_v27 = vld [vmem:[#allocation5 + $0x334] sm:$0xf0]  ;;  %v2903_v44 = vld [vmem:[#allocation5 + $0x448] sm:$0xf] }
  0x82   :  { %1662 = vmatpush.bf16.msra.mxu1 %v2856_v3  ;;  %v3412_v3 = vld [vmem:[#allocation5 + $0x374] sm:$0xf0]  ;;  %v2679_v57 = vld [vmem:[#allocation5 + $0x288] sm:$0xf] }
  0x83   :  { %1568 = vmatpush.bf16.msrb.mxu0 %v3092_v37  ;;  %v2984_v37 = vor.u32 %v3460_v29, %v2983_v28  ;;  %v2712_v28 = vor.u32 %v3392_v20, %v2711_v19  ;;  %v3488_v29 = vld [vmem:[#allocation5 + $0x5d4] sm:$0xf0]  ;;  %v3063_v62 = vld [vmem:[#allocation5 + $0x588] sm:$0xf] }
  0x84   :  { %1625 = vmatpush.bf16.msrb.mxu3 %v2584_v49  ;;  %v2520_v49 = vor.u32 %v3344_v32, %v2519_v31  ;;  %v3444_v31 = vld [vmem:[#allocation5 + $0x474] sm:$0xf0]  ;;  %v2695_v32 = vld [vmem:[#allocation5 + $0x2a8] sm:$0xf] }
  0x85   :  { %1681 = vmatpush.bf16.msra.mxu2 %v2984_v37  ;;  %v3388_v34 = vld [vmem:[#allocation5 + $0x2b4] sm:$0xf0]  ;;  %v3079_v37 = vld [vmem:[#allocation5 + $0x5a8] sm:$0xf] }
  0x86   :  { %1663 = vmatpush.bf16.msra.mxu1 %v2840_v15  ;;  %v3484_v40 = vld [vmem:[#allocation5 + $0x5b4] sm:$0xf0]  ;;  %v2696_v56 = vor.u32 %v3388_v34, %v2695_v32  ;;  %v2663_v7 = vld [vmem:[#allocation5 + $0x268] sm:$0xf] }
  0x87   :  { %1569 = vmatpush.bf16.msrb.mxu0 %v3076_v60  ;;  %v3012_v60 = vor.u32 %v3465_v36, %v3009_v43  ;;  %v3096_v36 = vor.u32 %v3488_v29, %v3095_v24  ;;  %v2743_v43 = vld [vmem:[#allocation5 + $0x308] sm:$0xf]  ;;  %v3440_v45 = vld [vmem:[#allocation5 + $0x454] sm:$0xf0]  ;;  %v3080_v61 = vor.u32 %v3484_v40, %v3079_v37  ;;  %v2441_v29 = vld [vmem:[#allocation5 + $0xb8] sm:$0xf0] }
  0x88   :  { %1626 = vmatpush.bf16.msrb.mxu3 %v2568_v4  ;;  %v2727_v4 = vld [vmem:[#allocation5 + $0x2e8] sm:$0xf]  ;;  %v2904_v0 = vor.u32 %v3440_v45, %v2903_v44  ;;  %v3380_v8 = vld [vmem:[#allocation5 + $0x274] sm:$0xf0]  ;;  %v3358_v37 = vld [vmem:[#allocation5 + $0x1cc] sm:$0xf] }
  0x89   :  { %1682 = vmatpush.bf16.msra.mxu2 %v2968_v63  ;;  %v2728_v15 = vor.u32 %v3396_v5, %v2727_v4  ;;  %v3480_v63 = vld [vmem:[#allocation5 + $0x594] sm:$0xf0]  ;;  %v2473_v4 = vld [vmem:[#allocation5 + $0xf8] sm:$0xf0]  ;;  %v2664_v20 = vor.u32 %v3380_v8, %v2663_v7  ;;  %v2631_v32 = vld [vmem:[#allocation5 + $0x228] sm:$0xf] }
  0x8a   :  { %1664 = vmatpush.bf16.msra.mxu1 %v2824_v26  ;;  %v2759_v26 = vld [vmem:[#allocation5 + $0x328] sm:$0xf]  ;;  %v2476_v5 = vor.u32 %v3330_v1, %v2473_v4  ;;  %v3476_v11 = vld [vmem:[#allocation5 + $0x574] sm:$0xf0]  ;;  %v2585_v40 = vld [vmem:[#allocation5 + $0x1d8] sm:$0xf0] }
  0x8b   :  { %1570 = vmatpush.bf16.msrb.mxu0 %v3060_v9  ;;  %v2792_v9 = vor.u32 %v3412_v3, %v2791_v2  ;;  %v2887_v2 = vld [vmem:[#allocation5 + $0x428] sm:$0xf]  ;;  %v3436_v3 = vld [vmem:[#allocation5 + $0x434] sm:$0xf0]  ;;  %v2425_v44 = vld [vmem:[#allocation5 + $0x98] sm:$0xf0] }
  0x8c   :  { %1627 = vmatpush.bf16.msrb.mxu3 %v2552_v17  ;;  %v2935_v17 = vld [vmem:[#allocation5 + $0x488] sm:$0xf]  ;;  %v3372_v34 = vld [vmem:[#allocation5 + $0x234] sm:$0xf0]  ;;  %v3394_v1 = vld [vmem:[#allocation5 + $0x2ec] sm:$0xf] }
  0x8d   :  { %1523 = vmatmul.bf16.gmra.mxu1 %v3798_v39  ;;  %1683 = vmatpush.bf16.msra.mxu2 %v2952_v12  ;;  %v2936_v25 = vor.u32 %v3448_v18, %v2935_v17  ;;  %v2888_v12 = vor.u32 %v3436_v3, %v2887_v2  ;;  %v3362_v17 = vld [vmem:[#allocation5 + $0x1ec] sm:$0xf]  ;;  %v2601_v18 = vld [vmem:[#allocation5 + $0x1f8] sm:$0xf0]  ;;  %v2632_v45 = vor.u32 %v3372_v34, %v2631_v32  ;;  %v3127_v2 = vld [vmem:[#allocation5 + $0x608] sm:$0xf] }
  0x8e   :  { %1504 = vmatmul.bf16.gmra.mxu0 %v3796_v38  ;;  %1665 = vmatpush.bf16.msra.mxu1 %v2808_v58  ;;  %v3384_v58 = vld [vmem:[#allocation5 + $0x294] sm:$0xf0]  ;;  %v2729_v4 = vld [vmem:[#allocation5 + $0x2f8] sm:$0xf0]  ;;  %v3306_v32 = vld [vmem:[#allocation5 + $0x2c] sm:$0xf] }
  0x8f   :  { %1571 = vmatpush.bf16.msrb.mxu0 %v3044_v22  ;;  %1542 = vmatmul.bf16.gmra.mxu2 %v3800_v42  ;;  %v2776_v22 = vor.u32 %v3408_v14, %v2775_v13  ;;  %v3326_v13 = vld [vmem:[#allocation5 + $0xcc] sm:$0xf]  ;;  %v2871_v14 = vld [vmem:[#allocation5 + $0x408] sm:$0xf]  ;;  %v3496_v3 = vld [vmem:[#allocation5 + $0x614] sm:$0xf0] }
  0x90   :  { %1628 = vmatpush.bf16.msrb.mxu3 %v2536_v30  ;;  %v2919_v30 = vld [vmem:[#allocation5 + $0x468] sm:$0xf]  ;;  %v2460_v19 = vor.u32 %v3326_v13, %v2457_v16  ;;  %v2732_v13 = vor.u32 %v3394_v1, %v2729_v4  ;;  %v2713_v16 = vld [vmem:[#allocation5 + $0x2d8] sm:$0xf0] }
  0x91   :  { %1561 = vmatmul.bf16.gmra.mxu3 %v3817_v50  ;;  %1684 = vmatpush.bf16.msra.mxu2 %v2936_v25  ;;  %v2920_v41 = vor.u32 %v3444_v31, %v2919_v30  ;;  %v3322_v25 = vld [vmem:[#allocation5 + $0xac] sm:$0xf]  ;;  %v2377_v34 = vld [vmem:[#allocation5 + $0x38] sm:$0xf0] }
  0x92   :  { %1666 = vmatpush.bf16.msra.mxu1 %v2792_v9  ;;  %v3064_v9 = vor.u32 %v3480_v63, %v3063_v62  ;;  %v2444_v30 = vor.u32 %v3322_v25, %v2441_v29  ;;  %v3354_v62 = vld [vmem:[#allocation5 + $0x1ac] sm:$0xf]  ;;  %v2569_v63 = vld [vmem:[#allocation5 + $0x1b8] sm:$0xf0] }
  0x93   :  { %1572 = vmatpush.bf16.msrb.mxu0 %v3028_v35  ;;  %v2760_v35 = vor.u32 %v3404_v27, %v2759_v26  ;;  %v3031_v26 = vld [vmem:[#allocation5 + $0x548] sm:$0xf]  ;;  %v3472_v27 = vld [vmem:[#allocation5 + $0x554] sm:$0xf0]  ;;  %v2572_v8 = vor.u32 %v3354_v62, %v2569_v63  ;;  %v3342_v29 = vld [vmem:[#allocation5 + $0x14c] sm:$0xf] }
  0x94   :  { %1629 = vmatpush.bf16.msrb.mxu3 %v2520_v49  ;;  %v3400_v49 = vld [vmem:[#allocation5 + $0x314] sm:$0xf0]  ;;  %v3458_v63 = vld [vmem:[#allocation5 + $0x4ec] sm:$0xf] }
  0x95   :  { %1685 = vmatpush.bf16.msra.mxu2 %v2920_v41  ;;  %v3468_v41 = vld [vmem:[#allocation5 + $0x534] sm:$0xf0] }
  0x96   :  { %1667 = vmatpush.bf16.msra.mxu1 %v2776_v22  ;;  %v2647_v22 = vld [vmem:[#allocation5 + $0x248] sm:$0xf] }
  0x97   :  { %1573 = vmatpush.bf16.msrb.mxu0 %v3012_v60  ;;  %v2744_v60 = vor.u32 %v3400_v49, %v2743_v43  ;;  %v3318_v43 = vld [vmem:[#allocation5 + $0x8c] sm:$0xf]  ;;  %v2615_v49 = vld [vmem:[#allocation5 + $0x208] sm:$0xf] }
  0x98   :  { %1630 = vmatpush.bf16.msrb.mxu3 %v2504_v6  ;;  %v2680_v6 = vor.u32 %v3384_v58, %v2679_v57  ;;  %v2999_v57 = vld [vmem:[#allocation5 + $0x508] sm:$0xf]  ;;  %v2588_v58 = vor.u32 %v3358_v37, %v2585_v40  ;;  %v3382_v40 = vld [vmem:[#allocation5 + $0x28c] sm:$0xf] }
  0x99   :  { %1686 = vmatpush.bf16.msra.mxu2 %v2904_v0  ;;  %v2428_v0 = vor.u32 %v3318_v43, %v2425_v44 }
  0x9a   :  { %1668 = vmatpush.bf16.msra.mxu1 %v2760_v35  ;;  %v3032_v35 = vor.u32 %v3472_v27, %v3031_v26  ;;  %v3386_v26 = vld [vmem:[#allocation5 + $0x2ac] sm:$0xf] }
  0x9b   :  { %1574 = vmatpush.bf16.msrb.mxu0 %v2996_v10  ;;  %v3047_v10 = vld [vmem:[#allocation5 + $0x568] sm:$0xf] }
  0x9c   :  { %1631 = vmatpush.bf16.msrb.mxu3 %v2488_v21  ;;  %v3048_v21 = vor.u32 %v3476_v11, %v3047_v10  ;;  %v3128_v10 = vor.u32 %v3496_v3, %v3127_v2  ;;  %v3350_v11 = vld [vmem:[#allocation5 + $0x18c] sm:$0xf]  ;;  %v2665_v3 = vld [vmem:[#allocation5 + $0x278] sm:$0xf0] }
  0x9d   :  { %3135 = vmatmul.msk.bf16.vlgmr.msrb.gmra.mxu1 %vm1332_vm0, %v3810_v54  ;;  %1687 = vmatpush.bf16.msra.mxu2 %v2888_v12  ;;  %v2553_v12 = vld [vmem:[#allocation5 + $0x198] sm:$0xf0]  ;;  %v3378_v2 = vld [vmem:[#allocation5 + $0x26c] sm:$0xf] }
  0x9e   :  { %1575 = vmatmul.bf16.vlgmr.msrb.gmra.mxu0 %v3808_v48  ;;  %1669 = vmatpush.bf16.msra.mxu1 %v2744_v60 }
  0x9f   :  { %1643 = vmatpush.bf16.msra.mxu0 %v2728_v15  ;;  %1613 = vmatmul.bf16.vlgmr.msrb.gmra.mxu2 %v3782_v47  ;;  %v3432_v15 = vld [vmem:[#allocation5 + $0x414] sm:$0xf0] }
  0xa0   :  { %1700 = vmatpush.bf16.msra.mxu3 %v3112_v23  ;;  %v3376_v23 = vld [vmem:[#allocation5 + $0x254] sm:$0xf0]  ;;  %v2872_v24 = vor.u32 %v3432_v15, %v2871_v14  ;;  %v3390_v14 = vld [vmem:[#allocation5 + $0x2cc] sm:$0xf] }
  0xa1   :  { %1632 = vmatmul.bf16.vlgmr.msrb.gmra.mxu3 %v3784_v51  ;;  %v2648_v31 = vor.u32 %v3376_v23, %v2647_v22  ;;  %v2537_v22 = vld [vmem:[#allocation5 + $0x178] sm:$0xf0]  ;;  %v2716_v23 = vor.u32 %v3390_v14, %v2713_v16 }
  0xa2   :  { %1738 = vmatpush.bf16.msrb.mxu1 %v2476_v5  ;;  %1688 = vmatpush.bf16.msra.mxu2 %v2872_v24  ;;  %v3314_v5 = vld [vmem:[#allocation5 + $0x6c] sm:$0xf]  ;;  %v3113_v14 = vld [vmem:[#allocation5 + $0x5f8] sm:$0xf0] }
  0xa3   :  { %1644 = vmatpush.bf16.msra.mxu0 %v2712_v28  ;;  %v2604_v28 = vor.u32 %v3362_v17, %v2601_v18  ;;  %v3310_v17 = vld [vmem:[#allocation5 + $0x4c] sm:$0xf]  ;;  %v2393_v18 = vld [vmem:[#allocation5 + $0x58] sm:$0xf0] }
  0xa4   :  { %1701 = vmatpush.bf16.msra.mxu3 %v3096_v36  ;;  %v3015_v36 = vld [vmem:[#allocation5 + $0x528] sm:$0xf]  ;;  %v2396_v24 = vor.u32 %v3310_v17, %v2393_v18  ;;  %v2841_v16 = vld [vmem:[#allocation5 + $0x3d8] sm:$0xf0] }
  0xa5   :  { %v3016_v60 = vor.u32 %v3468_v41, %v3015_v36  ;;  %v2681_v41 = vld [vmem:[#allocation5 + $0x298] sm:$0xf0] }
  0xa6   :  { %1739 = vmatpush.bf16.msrb.mxu1 %v2460_v19  ;;  %1757 = vmatpush.bf16.msrb.mxu2 %v2604_v28  ;;  %v3846_v19 = vld [vmem:[#allocation7] sm:$0xf]  ;;  %v2697_v28 = vld [vmem:[#allocation5 + $0x2b8] sm:$0xf0]  ;;  %v2684_v1 = vor.u32 %v3382_v40, %v2681_v41  ;;  %v3370_v41 = vld [vmem:[#allocation5 + $0x22c] sm:$0xf] }
  0xa7   :  { %1645 = vmatpush.bf16.msra.mxu0 %v2696_v56  ;;  %v3368_v56 = vld [vmem:[#allocation5 + $0x214] sm:$0xf0]  ;;  %v3849_v25 = vperm.slane %v3846_v19, 0  ;;  %v2700_v37 = vor.u32 %v3386_v26, %v2697_v28  ;;  %v3374_v28 = vld [vmem:[#allocation5 + $0x24c] sm:$0xf] }
  0xa8   :  { %1702 = vmatpush.bf16.msra.mxu3 %v3080_v61  ;;  %v3464_v61 = vld [vmem:[#allocation5 + $0x514] sm:$0xf0]  ;;  %v2616_v7 = vor.u32 %v3368_v56, %v2615_v49  ;;  %v2505_v49 = vld [vmem:[#allocation5 + $0x138] sm:$0xf0]  ;;  %v2380_v56 = vor.u32 %v3306_v32, %v2377_v34  ;;  %v3486_v32 = vld [vmem:[#allocation5 + $0x5cc] sm:$0xf] }
  0xa9   :  { %v3097_v34 = vld [vmem:[#allocation5 + $0x5d8] sm:$0xf0] }
  0xaa   :  { %1740 = vmatpush.bf16.msrb.mxu1 %v2444_v30  ;;  %1758 = vmatpush.bf16.msrb.mxu2 %v2588_v58  ;;  %v2521_v30 = vld [vmem:[#allocation5 + $0x158] sm:$0xf0]  ;;  %v3302_v58 = vld [vmem:[#allocation5 + $0xc] sm:$0xf] }
  0xab   :  { %1646 = vmatpush.bf16.msra.mxu0 %v2680_v6  ;;  %v2409_v6 = vld [vmem:[#allocation5 + $0x78] sm:$0xf0]  ;;  %v2524_v43 = vor.u32 %v3342_v29, %v2521_v30 }
  0xac   :  { %1703 = vmatpush.bf16.msra.mxu3 %v3064_v9  ;;  %v3000_v9 = vor.u32 %v3464_v61, %v2999_v57  ;;  %v2412_v15 = vor.u32 %v3314_v5, %v2409_v6  ;;  %v3426_v57 = vld [vmem:[#allocation5 + $0x3ec] sm:$0xf]  ;;  %v2857_v61 = vld [vmem:[#allocation5 + $0x3f8] sm:$0xf0] }
  0xad   :  { %3136 = vmatmul.msk.bf16.gmra.mxu1 %vm1332_vm0, %v3821_v59  ;;  %v2860_v62 = vor.u32 %v3426_v57, %v2857_v61  ;;  %v3334_v6 = vld [vmem:[#allocation5 + $0x10c] sm:$0xf]  ;;  %v2649_v29 = vld [vmem:[#allocation5 + $0x258] sm:$0xf0] }
  0xae   :  { %1580 = vmatmul.bf16.gmra.mxu0 %v3819_v53  ;;  %1741 = vmatpush.bf16.msrb.mxu1 %v2428_v0  ;;  %v2985_v0 = vld [vmem:[#allocation5 + $0x4f8] sm:$0xf0]  ;;  %v2652_v40 = vor.u32 %v3374_v28, %v2649_v29  ;;  %v3414_v57 = vld [vmem:[#allocation5 + $0x38c] sm:$0xf] }
  0xaf   :  { %1647 = vmatpush.bf16.msra.mxu0 %v2664_v20  ;;  %1618 = vmatmul.bf16.gmra.mxu2 %v3794_v33  ;;  %v2556_v20 = vor.u32 %v3350_v11, %v2553_v12  ;;  %v3442_v28 = vld [vmem:[#allocation5 + $0x46c] sm:$0xf]  ;;  %v2921_v29 = vld [vmem:[#allocation5 + $0x478] sm:$0xf0] }
  0xb0   :  { %1704 = vmatpush.bf16.msra.mxu3 %v3048_v21  ;;  %1759 = vmatpush.bf16.msrb.mxu2 %v2572_v8  ;;  %v3346_v21 = vld [vmem:[#allocation5 + $0x16c] sm:$0xf] }
  0xb1   :  { %1637 = vmatmul.bf16.gmra.mxu3 %v3796_v38  ;;  %v2540_v27 = vor.u32 %v3346_v21, %v2537_v22  ;;  %v3454_v21 = vld [vmem:[#allocation5 + $0x4cc] sm:$0xf]  ;;  %v2969_v22 = vld [vmem:[#allocation5 + $0x4d8] sm:$0xf0] }
  0xb2   :  { %1742 = vmatpush.bf16.msrb.mxu1 %v2412_v15  ;;  %v2988_v15 = vor.u32 %v3458_v63, %v2985_v0  ;;  %v3081_v63 = vld [vmem:[#allocation5 + $0x5b8] sm:$0xf0] }
  0xb3   :  { %1648 = vmatpush.bf16.msra.mxu0 %v2648_v31  ;;  %v2809_v0 = vld [vmem:[#allocation5 + $0x398] sm:$0xf0] }
  0xb4   :  { %1705 = vmatpush.bf16.msra.mxu3 %v3032_v35  ;;  %1760 = vmatpush.bf16.msrb.mxu2 %v2556_v20 }
  0xb6   :  { %1743 = vmatpush.bf16.msrb.mxu1 %v2396_v24  ;;  %v2668_v24 = vor.u32 %v3378_v2, %v2665_v3  ;;  %v3366_v3 = vld [vmem:[#allocation5 + $0x20c] sm:$0xf] }
  0xb7   :  { %1649 = vmatpush.bf16.msra.mxu0 %v2632_v45  ;;  %v3338_v45 = vld [vmem:[#allocation5 + $0x12c] sm:$0xf] }
  0xb8   :  { %1706 = vmatpush.bf16.msra.mxu3 %v3016_v60  ;;  %v1348_v31 = vpop.f32.mrf.mxu0  ;;  %1761 = vmatpush.bf16.msrb.mxu2 %v2540_v27  ;;  %v2361_v60 = vld [vmem:[#allocation5 + $0x18] sm:$0xf0]  ;;  %v2508_v4 = vor.u32 %v3338_v45, %v2505_v49  ;;  %v3100_v45 = vor.u32 %v3486_v32, %v3097_v34  ;;  %v3450_v49 = vld [vmem:[#allocation5 + $0x4ac] sm:$0xf] }
  0xb9   :  { %v1349_v35 = vadd.f32 %v1348_v31, %v3849_v25  ;;  %v2364_v8 = vor.u32 %v3302_v58, %v2361_v60  ;;  %v3418_v31 = vld [vmem:[#allocation5 + $0x3ac] sm:$0xf] }
  0xba   :  { %v1367_v36 = vpop.f32.mrf.mxu1  ;;  %1744 = vmatpush.bf16.msrb.mxu1 %v2380_v56  ;;  %v2953_v56 = vld [vmem:[#allocation5 + $0x4b8] sm:$0xf0] }
  0xbb   :  { %1650 = vmatpush.bf16.msra.mxu0 %v2616_v7  ;;  %v1368_v44 = vadd.f32 %v1367_v36, %v1349_v35  ;;  %v2489_v7 = vld [vmem:[#allocation5 + $0x118] sm:$0xf0]  ;;  %v2972_v35 = vor.u32 %v3454_v21, %v2969_v22 }
  0xbc   :  { %1707 = vmatpush.bf16.msra.mxu3 %v3000_v9  ;;  %1762 = vmatpush.bf16.msrb.mxu2 %v2524_v43  ;;  %v3422_v9 = vld [vmem:[#allocation5 + $0x3cc] sm:$0xf]  ;;  %v2492_v26 = vor.u32 %v3334_v6, %v2489_v7  ;;  %v2825_v36 = vld [vmem:[#allocation5 + $0x3b8] sm:$0xf0] }
  0xbd   :  { %1670 = vmatmul.bf16.vlgmr.msra.gmra.mxu1 %v3788_v55  ;;  %v2844_v20 = vor.u32 %v3422_v9, %v2841_v16  ;;  %v2633_v43 = vld [vmem:[#allocation5 + $0x238] sm:$0xf0]  ;;  %v3478_v16 = vld [vmem:[#allocation5 + $0x58c] sm:$0xf] }
  0xbe   :  { %1651 = vmatmul.bf16.vlgmr.msra.gmra.mxu0 %v3786_v52  ;;  %1745 = vmatpush.bf16.msrb.mxu1 %v2364_v8  ;;  %v2636_v6 = vor.u32 %v3370_v41, %v2633_v43  ;;  %v2617_v7 = vld [vmem:[#allocation5 + $0x218] sm:$0xf0]  ;;  %v3494_v8 = vld [vmem:[#allocation5 + $0x60c] sm:$0xf] }
  0xbf   :  { %1726 = vmatpush.bf16.msrb.mxu0 %v3128_v10  ;;  %1689 = vmatmul.bf16.vlgmr.msra.gmra.mxu2 %v3806_v46  ;;  %v3129_v9 = vld [vmem:[#allocation5 + $0x618] sm:$0xf0]  ;;  %v2620_v21 = vor.u32 %v3366_v3, %v2617_v7  ;;  %v3434_v3 = vld [vmem:[#allocation5 + $0x42c] sm:$0xf] }
  0xc0   :  { %1776 = vmatpush.bf16.msrb.mxu3 %v2732_v13  ;;  %v1350_v12 = vpop.f32.mrf.mxu0  ;;  %v3490_v13 = vld [vmem:[#allocation5 + $0x5ec] sm:$0xf]  ;;  %1763 = vmatpush.bf16.msrb.mxu2 %v2508_v4  ;;  %v2812_v4 = vor.u32 %v3414_v57, %v2809_v0 }
  0xc1   :  { %1708 = vmatmul.bf16.vlgmr.msra.gmra.mxu3 %v3808_v48  ;;  %v1386_v5 = vpop.f32.mrf.mxu2  ;;  %v1351_v17 = vadd.f32 %v1350_v12, %v3849_v25  ;;  %v3116_v30 = vor.u32 %v3490_v13, %v3113_v14  ;;  %v3446_v13 = vld [vmem:[#allocation5 + $0x48c] sm:$0xf]  ;;  %v2937_v14 = vld [vmem:[#allocation5 + $0x498] sm:$0xf0] }
  0xc2   :  { %v1387_v10 = vadd.f32 %v1386_v5, %v1368_v44  ;;  %v1405_v11 = vpop.f32.mrf.mxu3  ;;  %v1369_v18 = vpop.f32.mrf.mxu1  ;;  %1814 = vmatpush.bf16.msra.mxu1 %v2988_v15  ;;  %v3410_v15 = vld [vmem:[#allocation5 + $0x36c] sm:$0xf]  ;;  %v2940_v22 = vor.u32 %v3446_v13, %v2937_v14 }
  0xc3   :  { %1795 = vmatpush.bf16.msra.mxu0 %v2860_v62  ;;  %v1370_v27 = vadd.f32 %v1369_v18, %v1351_v17  ;;  %v3482_v62 = vld [vmem:[#allocation5 + $0x5ac] sm:$0xf]  ;;  %v3065_v17 = vld [vmem:[#allocation5 + $0x598] sm:$0xf0] }
  0xc4   :  { %1777 = vmatpush.bf16.msrb.mxu3 %v2716_v23  ;;  %v3857_v23 = vadd.f32 %v1405_v11, %v1387_v10  ;;  %1764 = vmatpush.bf16.msrb.mxu2 %v2492_v26  ;;  %v2956_v10 = vor.u32 %v3450_v49, %v2953_v56  ;;  %v3084_v12 = vor.u32 %v3482_v62, %v3081_v63  ;;  %v2793_v18 = vld [vmem:[#allocation5 + $0x378] sm:$0xf0]  ;;  %v3438_v57 = vld [vmem:[#allocation5 + $0x44c] sm:$0xf] }
  0xc5   :  { %v3132_v26 = vor.u32 %v3494_v8, %v3129_v9  ;;  %v3033_v62 = vld [vmem:[#allocation5 + $0x558] sm:$0xf0]  ;;  %v3466_v9 = vld [vmem:[#allocation5 + $0x52c] sm:$0xf] }
  0xc6   :  { %1815 = vmatpush.bf16.msra.mxu1 %v2972_v35  ;;  %v3474_v35 = vld [vmem:[#allocation5 + $0x56c] sm:$0xf]  ;;  %v2761_v63 = vld [vmem:[#allocation5 + $0x338] sm:$0xf0] }
  0xc7   :  { %1796 = vmatpush.bf16.msra.mxu0 %v2844_v20  ;;  %v2796_v20 = vor.u32 %v3410_v15, %v2793_v18  ;;  %v3430_v18 = vld [vmem:[#allocation5 + $0x40c] sm:$0xf] }
  0xc8   :  { %1778 = vmatpush.bf16.msrb.mxu3 %v2700_v37  ;;  %v2828_v37 = vor.u32 %v3418_v31, %v2825_v36  ;;  %1833 = vmatpush.bf16.msra.mxu2 %v3116_v30  ;;  %v3406_v30 = vld [vmem:[#allocation5 + $0x34c] sm:$0xf]  ;;  %v3049_v36 = vld [vmem:[#allocation5 + $0x578] sm:$0xf0] }
  0xc9   :  { %v1388_v44 = vpop.f32.mrf.mxu2  ;;  %v1353_v61 = vpop.f32.mrf.mxu0  ;;  %v3052_v56 = vor.u32 %v3474_v35, %v3049_v36 }
  0xca   :  { %v1389_v58 = vadd.f32 %v1388_v44, %v1370_v27  ;;  %v1407_v60 = vpop.f32.mrf.mxu3  ;;  %v1372_v2 = vpop.f32.mrf.mxu1  ;;  %1816 = vmatpush.bf16.msra.mxu1 %v2956_v10  ;;  %v3068_v27 = vor.u32 %v3478_v16, %v3065_v17  ;;  %v3017_v10 = vld [vmem:[#allocation5 + $0x538] sm:$0xf0] }
  0xcb   :  { %1797 = vmatpush.bf16.msra.mxu0 %v2828_v37  ;;  %v2777_v37 = vld [vmem:[#allocation5 + $0x358] sm:$0xf0]  ;;  %v3020_v17 = vor.u32 %v3466_v9, %v3017_v10  ;;  %v3497_v9 = vld [vmem:[#allocation8] sm:$0xff] }
  0xcc   :  { %1779 = vmatpush.bf16.msrb.mxu3 %v2684_v1  ;;  %v1354_v1 = vadd.f32 %v1353_v61, %v3849_v25  ;;  %v3860_v5 = vadd.f32 %v1407_v60, %v1389_v58  ;;  %1834 = vmatpush.bf16.msra.mxu2 %v3100_v45  ;;  %v2780_v43 = vor.u32 %v3406_v30, %v2777_v37  ;;  %v2905_v58 = vld [vmem:[#allocation5 + $0x458] sm:$0xf0]  ;;  %v3402_v60 = vld [vmem:[#allocation5 + $0x32c] sm:$0xf]  ;;  %v3503_v30 = vld [vmem:[#allocation8 + $0x30] sm:$0xff] }
  0xcd   :  { %1675 = vmatmul.bf16.gmra.mxu1 %v3800_v42  ;;  %v2924_v45 = vor.u32 %v3442_v28, %v2921_v29  ;;  %v3470_v61 = vld [vmem:[#allocation5 + $0x54c] sm:$0xf]  ;;  %v2764_v0 = vor.u32 %v3402_v60, %v2761_v63  ;;  %v3511_v60 = vld [vmem:[#allocation8 + $0x70] sm:$0xff] }
  0xce   :  { %v1373_v11 = vadd.f32 %v1372_v2, %v1354_v1  ;;  %1656 = vmatmul.bf16.gmra.mxu0 %v3798_v39  ;;  %1817 = vmatpush.bf16.msra.mxu1 %v2940_v22  ;;  %v3036_v2 = vor.u32 %v3470_v61, %v3033_v62  ;;  %v3001_v22 = vld [vmem:[#allocation5 + $0x518] sm:$0xf0]  ;;  %v3499_v63 = vld [vmem:[#allocation8 + $0x10] sm:$0xff] }
  0xcf   :  { %1798 = vmatpush.bf16.msra.mxu0 %v2812_v4  ;;  %1694 = vmatmul.bf16.gmra.mxu2 %v3817_v50  ;;  %v2889_v4 = vld [vmem:[#allocation5 + $0x438] sm:$0xf0] }
  0xd0   :  { %1780 = vmatpush.bf16.msrb.mxu3 %v2668_v24  ;;  %1835 = vmatpush.bf16.msra.mxu2 %v3084_v12  ;;  %v2892_v15 = vor.u32 %v3434_v3, %v2889_v4  ;;  %v3498_v3 = vld [vmem:[#allocation8 + $0x8] sm:$0xff] }
  0xd1   :  { %1713 = vmatmul.bf16.gmra.mxu3 %v3819_v53  ;;  %v1391_v24 = vpop.f32.mrf.mxu2  ;;  %v1355_v34 = vpop.f32.mrf.mxu0 }
  0xd2   :  { %v1392_v31 = vadd.f32 %v1391_v24, %v1373_v11  ;;  %v1410_v32 = vpop.f32.mrf.mxu3  ;;  %v1374_v41 = vpop.f32.mrf.mxu1  ;;  %1818 = vmatpush.bf16.msra.mxu1 %v2924_v45  ;;  %v2745_v11 = vld [vmem:[#allocation5 + $0x318] sm:$0xf0] }
  0xd3   :  { %1799 = vmatpush.bf16.msra.mxu0 %v2796_v20  ;;  %v2873_v20 = vld [vmem:[#allocation5 + $0x418] sm:$0xf0] }
  0xd4   :  { %1781 = vmatpush.bf16.msrb.mxu3 %v2652_v40  ;;  %v1356_v40 = vadd.f32 %v1355_v34, %v3849_v25  ;;  %v3867_v44 = vadd.f32 %v1410_v32, %v1392_v31  ;;  %1836 = vmatpush.bf16.msra.mxu2 %v3068_v27  ;;  %v2908_v25 = vor.u32 %v3438_v57, %v2905_v58  ;;  %v3504_v24 = vld [vmem:[#allocation8 + $0x38] sm:$0xff] }
  0xd6   :  { %v1375_v49 = vadd.f32 %v1374_v41, %v1356_v40  ;;  %1819 = vmatpush.bf16.msra.mxu1 %v2908_v25  ;;  %v3501_v41 = vld [vmem:[#allocation8 + $0x20] sm:$0xff] }
  0xd7   :  { %1800 = vmatpush.bf16.msra.mxu0 %v2780_v43 }
  0xd8   :  { %1782 = vmatpush.bf16.msrb.mxu3 %v2636_v6  ;;  %1837 = vmatpush.bf16.msra.mxu2 %v3052_v56  ;;  %v3398_v6 = vld [vmem:[#allocation5 + $0x30c] sm:$0xf] }
  0xd9   :  { %v1393_v1 = vpop.f32.mrf.mxu2  ;;  %v2748_v16 = vor.u32 %v3398_v6, %v2745_v11 }
  0xda   :  { %v1394_v7 = vadd.f32 %v1393_v1, %v1375_v49  ;;  %v1412_v8 = vpop.f32.mrf.mxu3  ;;  %v1443_v13 = vpop.f32.mrf.mxu1  ;;  %1820 = vmatpush.bf16.msra.mxu1 %v2892_v15 }
  0xdb   :  { %1801 = vmatpush.bf16.msra.mxu0 %v2764_v0  ;;  %v1424_v12 = vpop.f32.mrf.mxu0 }
  0xdc   :  { %1783 = vmatpush.bf16.msrb.mxu3 %v2620_v21  ;;  %v3869_v14 = vadd.f32 %v1412_v8, %v1394_v7  ;;  %1838 = vmatpush.bf16.msra.mxu2 %v3036_v2  ;;  %v3462_v21 = vld [vmem:[#allocation5 + $0x50c] sm:$0xf]  ;;  %v1425_v31 = vadd.f32 %v1424_v12, %v3857_v23  ;;  %v3512_v23 = vld [vmem:[#allocation8 + $0x78] sm:$0xff] }
  0xdd   :  { %1746 = vmatmul.bf16.vlgmr.msrb.gmra.mxu1 %v3782_v47  ;;  %v3004_v27 = vor.u32 %v3462_v21, %v3001_v22  ;;  %v3508_v12 = vld [vmem:[#allocation8 + $0x58] sm:$0xff]  ;;  %v3506_v22 = vld [vmem:[#allocation8 + $0x48] sm:$0xff] }
  0xde   :  { %3137 = vmatmul.msk.bf16.vlgmr.msrb.gmra.mxu0 %vm1332_vm0, %v3810_v54 }
  0xdf   :  { %1765 = vmatmul.bf16.vlgmr.msrb.gmra.mxu2 %v3784_v51  ;;  %1802 = vmatpush.bf16.msra.mxu0 %v2748_v16  ;;  %v3502_v51 = vld [vmem:[#allocation8 + $0x28] sm:$0xff]  ;;  %v3507_v16 = vld [vmem:[#allocation8 + $0x50] sm:$0xff] }
  0xe0   :  { %1859 = vmatpush.bf16.msra.mxu3 %v3132_v26  ;;  %v2876_v26 = vor.u32 %v3430_v18, %v2873_v20  ;;  %1839 = vmatpush.bf16.msra.mxu2 %v3020_v17 }
  0xe1   :  { %1784 = vmatmul.bf16.vlgmr.msrb.gmra.mxu3 %v3786_v52  ;;  %v1444_v52 = vadd.f32 %v1443_v13, %v1425_v31 }
  0xe2   :  { %v1462_v28 = vpop.f32.mrf.mxu2  ;;  %v1445_v32 = vpop.f32.mrf.mxu1  ;;  %1821 = vmatpush.bf16.msra.mxu1 %v2876_v26 }
  0xe3   :  { %2155 = vmatpush.bf16.msrb.mxu0 %v3504_v24  ;;  %v1426_v47 = vpop.f32.mrf.mxu0  ;;  %v1463_v35 = vadd.f32 %v1462_v28, %v1444_v52  ;;  %v3505_v24 = vld [vmem:[#allocation8 + $0x40] sm:$0xff] }
  0xe4   :  { %v3876_v29 = vpop.f32.mrf.mxu3  ;;  %v1427_v34 = vadd.f32 %v1426_v47, %v3860_v5  ;;  %1840 = vmatpush.bf16.msra.mxu2 %v3004_v27  ;;  %v3500_v5 = vld [vmem:[#allocation8 + $0x18] sm:$0xff] }
  0xe5   :  { %v1871_v56 = vmax.f32 %v1463_v35, 0.0 }
  0xe6   :  { %v1446_v36 = vadd.f32 %v1445_v32, %v1427_v34  ;;  %2174 = vmatpush.bf16.msrb.mxu1 %v3512_v23 }
  0xe7   :  { %2156 = vmatpush.bf16.msrb.mxu0 %v3503_v30 }
  0xea   :  { %v1464_v37 = vpop.f32.mrf.mxu2  ;;  %v1448_v49 = vpop.f32.mrf.mxu1  ;;  %2175 = vmatpush.bf16.msrb.mxu1 %v3511_v60 }
  0xeb   :  { %2157 = vmatpush.bf16.msrb.mxu0 %v3502_v51  ;;  %v1465_v43 = vadd.f32 %v1464_v37, %v1446_v36  ;;  %v1429_v45 = vpop.f32.mrf.mxu0 }
  0xec   :  { %v3880_v40 = vpop.f32.mrf.mxu3  ;;  %v1430_v0 = vadd.f32 %v1429_v45, %v3867_v44 }
  0xed   :  { %v1875_v57 = vmax.f32 %v1465_v43, 0.0  ;;  %1751 = vmatmul.bf16.gmra.mxu1 %v3794_v33  ;;  %v3510_v33 = vld [vmem:[#allocation8 + $0x68] sm:$0xff] }
  0xee   :  { %3138 = vmatmul.msk.bf16.gmra.mxu0 %vm1332_vm0, %v3821_v59  ;;  %2176 = vmatpush.bf16.msrb.mxu1 %v3510_v33 }
  0xef   :  { %2158 = vmatpush.bf16.msrb.mxu0 %v3501_v41  ;;  %v3885_v58 = vpack.c.bf16 %v1875_v57, %v1871_v56  ;;  %1770 = vmatmul.bf16.gmra.mxu2 %v3796_v38  ;;  %v1449_v38 = vadd.f32 %v1448_v49, %v1430_v0 }
  0xf1   :  { %1789 = vmatmul.bf16.gmra.mxu3 %v3798_v39  ;;  %v3509_v39 = vld [vmem:[#allocation8 + $0x60] sm:$0xff] }
  0xf2   :  { %v1467_v61 = vpop.f32.mrf.mxu2  ;;  %v1450_v1 = vpop.f32.mrf.mxu1  ;;  %2177 = vmatpush.bf16.msrb.mxu1 %v3509_v39 }
  0xf3   :  { %2159 = vmatpush.bf16.msrb.mxu0 %v3500_v5  ;;  %v1431_v25 = vpop.f32.mrf.mxu0  ;;  %v1468_v4 = vadd.f32 %v1467_v61, %v1449_v38  ;;  %v3520_v38 = vld [vmem:[#allocation8 + $0xb8] sm:$0xff] }
  0xf4   :  { %v3889_v62 = vpop.f32.mrf.mxu3  ;;  %v1432_v2 = vadd.f32 %v1431_v25, %v3869_v14  ;;  %2193 = vmatpush.bf16.msrb.mxu2 %v3520_v38 }
  0xf5   :  { %v1879_v13 = vmax.f32 %v1468_v4, 0.0 }
  0xf6   :  { %v1451_v6 = vadd.f32 %v1450_v1, %v1432_v2  ;;  %2178 = vmatpush.bf16.msrb.mxu1 %v3508_v12 }
  0xf7   :  { %2160 = vmatpush.bf16.msrb.mxu0 %v3499_v63 }
  0xfa   :  { %v1469_v7 = vpop.f32.mrf.mxu2  ;;  %v1519_v11 = vpop.f32.mrf.mxu1  ;;  %2179 = vmatpush.bf16.msrb.mxu1 %v3507_v16 }
  0xfb   :  { %2161 = vmatpush.bf16.msrb.mxu0 %v3498_v3  ;;  %v1470_v10 = vadd.f32 %v1469_v7, %v1451_v6  ;;  %v1500_v44 = vpop.f32.mrf.mxu0 }
  0xfc   :  { %v3893_v8 = vpop.f32.mrf.mxu3 }
  0xfd   :  { %v1883_v15 = vmax.f32 %v1470_v10, 0.0  ;;  %1822 = vmatmul.bf16.vlgmr.msra.gmra.mxu1 %v3806_v46 }
  0xfe   :  { %1803 = vmatmul.bf16.vlgmr.msra.gmra.mxu0 %v3788_v55  ;;  %2180 = vmatpush.bf16.msrb.mxu1 %v3506_v22 }
  0xff   :  { %2162 = vmatpush.bf16.msrb.mxu0 %v3497_v9  ;;  %1841 = vmatmul.bf16.vlgmr.msra.gmra.mxu2 %v3808_v48  ;;  %v3900_v14 = vpack.c.bf16 %v1883_v15, %v1879_v13  ;;  %v345_v48 = vperm.slane %v3846_v19, 1  ;;  %v3518_v13 = vld [vmem:[#allocation8 + $0xa8] sm:$0xff] }
 0x101   :  { %3139 = vmatmul.msk.bf16.vlgmr.msra.gmra.mxu3 %vm1332_vm0, %v3810_v54  ;;  %v1482_v54 = vadd.f32 %v3876_v29, %v345_v48  ;;  %v1484_v34 = vadd.f32 %v3880_v40, %v345_v48  ;;  %v1487_v29 = vadd.f32 %v3889_v62, %v345_v48  ;;  %v1489_v61 = vadd.f32 %v3893_v8, %v345_v48  ;;  %v3519_v8 = vld [vmem:[#allocation8 + $0xb0] sm:$0xff] }
 0x102   :  { %v1538_v17 = vpop.f32.mrf.mxu2  ;;  %v1521_v21 = vpop.f32.mrf.mxu1  ;;  %2181 = vmatpush.bf16.msrb.mxu1 %v3505_v24  ;;  %2194 = vmatpush.bf16.msrb.mxu2 %v3519_v8 }
 0x103   :  { %v1502_v20 = vpop.f32.mrf.mxu0  ;;  %v1501_v32 = vadd.f32 %v1500_v44, %v1482_v54  ;;  %v3515_v54 = vld [vmem:[#allocation8 + $0x90] sm:$0xff] }
 0x104   :  { %v1557_v18 = vpop.f32.mrf.mxu3  ;;  %v1503_v52 = vadd.f32 %v1502_v20, %v1484_v34  ;;  %v3513_v34 = vld [vmem:[#allocation8 + $0x80] sm:$0xff] }
 0x105   :  { %v1520_v51 = vadd.f32 %v1519_v11, %v1501_v32 }
 0x106   :  { %2195 = vmatpush.bf16.msrb.mxu2 %v3518_v13 }
 0x107   :  { %v1539_v35 = vadd.f32 %v1538_v17, %v1520_v51 }
 0x109   :  { %v1558_v41 = vadd.f32 %v1557_v18, %v1539_v35 }
 0x10a   :  { %v1540_v55 = vpop.f32.mrf.mxu2  ;;  %v1524_v27 = vpop.f32.mrf.mxu1 }
 0x10b   :  { %v1505_v46 = vpop.f32.mrf.mxu0 }
 0x10c   :  { %v1559_v26 = vpop.f32.mrf.mxu3  ;;  %v1506_v57 = vadd.f32 %v1505_v46, %v1487_v29  ;;  %v3516_v46 = vld [vmem:[#allocation8 + $0x98] sm:$0xff] }
 0x10d   :  { %1827 = vmatmul.bf16.gmra.mxu1 %v3817_v50 }
 0x10e   :  { %1808 = vmatmul.bf16.gmra.mxu0 %v3800_v42  ;;  %v1525_v0 = vadd.f32 %v1524_v27, %v1506_v57  ;;  %v3527_v57 = vld [vmem:[#allocation8 + $0xf0] sm:$0xff] }
 0x10f   :  { %1846 = vmatmul.bf16.gmra.mxu2 %v3819_v53  ;;  %v1522_v53 = vadd.f32 %v1521_v21, %v1503_v52  ;;  %v3517_v21 = vld [vmem:[#allocation8 + $0xa0] sm:$0xff] }
 0x110   :  { %2196 = vmatpush.bf16.msrb.mxu2 %v3517_v21 }
 0x111   :  { %3140 = vmatmul.msk.bf16.gmra.mxu3 %vm1332_vm0, %v3821_v59  ;;  %v1541_v43 = vadd.f32 %v1540_v55, %v1522_v53 }
 0x112   :  { %v1543_v28 = vpop.f32.mrf.mxu2  ;;  %v1526_v47 = vpop.f32.mrf.mxu1 }
 0x113   :  { %v1507_v31 = vpop.f32.mrf.mxu0  ;;  %v1560_v45 = vadd.f32 %v1559_v26, %v1541_v43  ;;  %v1544_v33 = vadd.f32 %v1543_v28, %v1525_v0  ;;  %v3528_v43 = vld [vmem:[#allocation8 + $0xf8] sm:$0xff]  ;;  %v3526_v0 = vld [vmem:[#allocation8 + $0xe8] sm:$0xff] }
 0x114   :  { %v1562_v30 = vpop.f32.mrf.mxu3  ;;  %v1508_v25 = vadd.f32 %v1507_v31, %v1489_v61  ;;  %2197 = vmatpush.bf16.msrb.mxu2 %v3516_v46  ;;  %v3514_v31 = vld [vmem:[#allocation8 + $0x88] sm:$0xff]  ;;  %2212 = vmatpush.bf16.msrb.mxu3 %v3528_v43 }
 0x115   :  { %v1563_v7 = vadd.f32 %v1562_v30, %v1544_v33 }
 0x116   :  { %v1527_v6 = vadd.f32 %v1526_v47, %v1508_v25 }
 0x118   :  { %2198 = vmatpush.bf16.msrb.mxu2 %v3515_v54  ;;  %2213 = vmatpush.bf16.msrb.mxu3 %v3527_v57  ;;  %v3521_v54 = vld [vmem:[#allocation8 + $0xc0] sm:$0xff] }
 0x11a   :  { %v1545_v42 = vpop.f32.mrf.mxu2  ;;  %v1595_v37 = vpop.f32.mrf.mxu1 }
 0x11b   :  { %v1576_v50 = vpop.f32.mrf.mxu0  ;;  %v1546_v9 = vadd.f32 %v1545_v42, %v1527_v6 }
 0x11c   :  { %v1564_v36 = vpop.f32.mrf.mxu3  ;;  %v1577_v59 = vadd.f32 %v1576_v50, %v1558_v41  ;;  %2199 = vmatpush.bf16.msrb.mxu2 %v3514_v31  ;;  %2214 = vmatpush.bf16.msrb.mxu3 %v3526_v0 }
 0x11d   :  { %v1565_v44 = vadd.f32 %v1564_v36, %v1546_v9  ;;  %v346_v36 = vperm.slane %v3846_v19, 2 }
 0x11e   :  { %2163 = vmatmul.bf16.vlgmr.msrb.gmra.mxu0 %v3885_v58  ;;  %v1596_v5 = vadd.f32 %v1595_v37, %v1577_v59 }
 0x120   :  { %v1872_v1 = vmax.f32 %v1596_v5, 0.0  ;;  %2200 = vmatpush.bf16.msrb.mxu2 %v3513_v34 }
 0x122   :  { %v3912_v49 = vpop.f32.mrf.mxu2  ;;  %v1597_v56 = vpop.f32.mrf.mxu1 }
 0x123   :  { %v1578_v40 = vpop.f32.mrf.mxu0  ;;  %v1615_v50 = vadd.f32 %v3912_v49, %v346_v36 }
 0x124   :  { %v3914_v23 = vpop.f32.mrf.mxu3  ;;  %v1579_v60 = vadd.f32 %v1578_v40, %v1560_v45 }
 0x125   :  { %v1634_v45 = vadd.f32 %v3914_v23, %v1615_v50 }
 0x126   :  { %v1598_v63 = vadd.f32 %v1597_v56, %v1579_v60 }
 0x128   :  { %v1876_v58 = vmax.f32 %v1598_v63, 0.0 }
 0x12a   :  { %v1888_v2 = vpack.c.bf16 %v1876_v58, %v1872_v1  ;;  %v1616_v62 = vpop.f32.mrf.mxu2  ;;  %v1600_v4 = vpop.f32.mrf.mxu1 }
 0x12b   :  { %v1581_v39 = vpop.f32.mrf.mxu0  ;;  %v1617_v37 = vadd.f32 %v1616_v62, %v346_v36 }
 0x12c   :  { %v1635_v3 = vpop.f32.mrf.mxu3  ;;  %2182 = vmatmul.bf16.vlgmr.msrb.gmra.mxu1 %v1888_v2  ;;  %v1582_v10 = vadd.f32 %v1581_v39, %v1563_v7  ;;  %v3525_v2 = vld [vmem:[#allocation8 + $0xe0] sm:$0xff]  ;;  %v3524_v7 = vld [vmem:[#allocation8 + $0xd8] sm:$0xff] }
 0x12d   :  { %v1636_v40 = vadd.f32 %v1635_v3, %v1617_v37  ;;  %2215 = vmatpush.bf16.msrb.mxu3 %v3525_v2 }
 0x12e   :  { %2168 = vmatmul.bf16.gmra.mxu0 %v3900_v14  ;;  %v1601_v17 = vadd.f32 %v1600_v4, %v1582_v10 }
 0x130   :  { %v1880_v22 = vmax.f32 %v1601_v17, 0.0 }
 0x131   :  { %2216 = vmatpush.bf16.msrb.mxu3 %v3524_v7 }
 0x132   :  { %v1619_v11 = vpop.f32.mrf.mxu2  ;;  %v1602_v16 = vpop.f32.mrf.mxu1 }
 0x133   :  { %v1583_v15 = vpop.f32.mrf.mxu0  ;;  %v1620_v62 = vadd.f32 %v1619_v11, %v346_v36 }
 0x134   :  { %v3918_v12 = vpop.f32.mrf.mxu3  ;;  %v1584_v18 = vadd.f32 %v1583_v15, %v1565_v44 }
 0x135   :  { %v1639_v10 = vadd.f32 %v3918_v12, %v1620_v62 }
 0x136   :  { %v1603_v20 = vadd.f32 %v1602_v16, %v1584_v18  ;;  %v3523_v18 = vld [vmem:[#allocation8 + $0xd0] sm:$0xff] }
 0x137   :  { %2217 = vmatpush.bf16.msrb.mxu3 %v3523_v18 }
 0x138   :  { %v1884_v24 = vmax.f32 %v1603_v20, 0.0 }
 0x13a   :  { %v1892_v55 = vpack.c.bf16 %v1884_v24, %v1880_v22  ;;  %v1621_v14 = vpop.f32.mrf.mxu2  ;;  %v1671_v48 = vpop.f32.mrf.mxu1 }
 0x13b   :  { %v1652_v27 = vpop.f32.mrf.mxu0  ;;  %v1622_v23 = vadd.f32 %v1621_v14, %v346_v36 }
 0x13c   :  { %v1640_v26 = vpop.f32.mrf.mxu3  ;;  %2187 = vmatmul.bf16.gmra.mxu1 %v1892_v55  ;;  %v1653_v56 = vadd.f32 %v1652_v27, %v1634_v45  ;;  %v3522_v55 = vld [vmem:[#allocation8 + $0xc8] sm:$0xff] }
 0x13d   :  { %v1641_v13 = vadd.f32 %v1640_v26, %v1622_v23  ;;  %2218 = vmatpush.bf16.msrb.mxu3 %v3522_v55 }
 0x13e   :  { %v1672_v60 = vadd.f32 %v1671_v48, %v1653_v56 }
 0x141   :  { %2219 = vmatpush.bf16.msrb.mxu3 %v3521_v54 }
 0x142   :  { %v1690_v28 = vpop.f32.mrf.mxu2  ;;  %v1673_v32 = vpop.f32.mrf.mxu1 }
 0x143   :  { %v1654_v47 = vpop.f32.mrf.mxu0  ;;  %v1691_v1 = vadd.f32 %v1690_v28, %v1672_v60 }
 0x144   :  { %v1709_v30 = vpop.f32.mrf.mxu3  ;;  %v1655_v5 = vadd.f32 %v1654_v47, %v1636_v40 }
 0x145   :  { %v1710_v38 = vadd.f32 %v1709_v30, %v1691_v1 }
 0x146   :  { %v1674_v58 = vadd.f32 %v1673_v32, %v1655_v5  ;;  %v347_v32 = vperm.slane %v3846_v19, 3 }
 0x14a   :  { %v1692_v51 = vpop.f32.mrf.mxu2  ;;  %v1676_v42 = vpop.f32.mrf.mxu1 }
 0x14b   :  { %v1657_v35 = vpop.f32.mrf.mxu0  ;;  %v1693_v33 = vadd.f32 %v1692_v51, %v1674_v58 }
 0x14c   :  { %v1711_v52 = vpop.f32.mrf.mxu3  ;;  %v1658_v15 = vadd.f32 %v1657_v35, %v1639_v10 }
 0x14d   :  { %v1712_v3 = vadd.f32 %v1711_v52, %v1693_v33 }
 0x14e   :  { %v1677_v21 = vadd.f32 %v1676_v42, %v1658_v15 }
 0x152   :  { %v1695_v53 = vpop.f32.mrf.mxu2  ;;  %v1678_v29 = vpop.f32.mrf.mxu1 }
 0x153   :  { %v1659_v59 = vpop.f32.mrf.mxu0  ;;  %v1696_v27 = vadd.f32 %v1695_v53, %v1677_v21 }
 0x154   :  { %v1714_v41 = vpop.f32.mrf.mxu3  ;;  %v1660_v11 = vadd.f32 %v1659_v59, %v1641_v13 }
 0x155   :  { %v1715_v26 = vadd.f32 %v1714_v41, %v1696_v27 }
 0x156   :  { %v1679_v48 = vadd.f32 %v1678_v29, %v1660_v11 }
 0x15a   :  { %v1697_v61 = vpop.f32.mrf.mxu2  ;;  %v1747_v49 = vpop.f32.mrf.mxu1 }
 0x15b   :  { %v1728_v25 = vpop.f32.mrf.mxu0  ;;  %v1698_v12 = vadd.f32 %v1697_v61, %v1679_v48  ;;  %v1748_v36 = vadd.f32 %v1747_v49, %v347_v32 }
 0x15c   :  { %v1716_v63 = vpop.f32.mrf.mxu3  ;;  %v1729_v39 = vadd.f32 %v1728_v25, %v1710_v38 }
 0x15d   :  { %v1717_v28 = vadd.f32 %v1716_v63, %v1698_v12 }
 0x15e   :  { %v1873_v16 = vmax.f32 %v1729_v39, 0.0 }
 0x162   :  { %v1766_v4 = vpop.f32.mrf.mxu2  ;;  %v1749_v8 = vpop.f32.mrf.mxu1 }
 0x163   :  { %v1730_v9 = vpop.f32.mrf.mxu0  ;;  %v1767_v43 = vadd.f32 %v1766_v4, %v1748_v36  ;;  %v1750_v29 = vadd.f32 %v1749_v8, %v347_v32 }
 0x164   :  { %v1785_v6 = vpop.f32.mrf.mxu3  ;;  %v1731_v44 = vadd.f32 %v1730_v9, %v1712_v3 }
 0x165   :  { %v1786_v45 = vadd.f32 %v1785_v6, %v1767_v43 }
 0x166   :  { %v1877_v17 = vmax.f32 %v1731_v44, 0.0 }
 0x168   :  { %v1889_v20 = vpack.c.bf16 %v1877_v17, %v1873_v16 }
 0x16a   :  { %v1768_v22 = vpop.f32.mrf.mxu2  ;;  %2201 = vmatmul.bf16.vlgmr.msrb.gmra.mxu2 %v1889_v20  ;;  %v1752_v46 = vpop.f32.mrf.mxu1 }
 0x16b   :  { %v1733_v14 = vpop.f32.mrf.mxu0  ;;  %v1769_v40 = vadd.f32 %v1768_v22, %v1750_v29  ;;  %v1753_v25 = vadd.f32 %v1752_v46, %v347_v32 }
 0x16c   :  { %v1787_v24 = vpop.f32.mrf.mxu3  ;;  %v1734_v30 = vadd.f32 %v1733_v14, %v1715_v26  ;;  %v3536_v26 = vld [vmem:[#allocation10 + $0x38] sm:$0xff] }
 0x16d   :  { %v1788_v19 = vadd.f32 %v1787_v24, %v1769_v40  ;;  %2305 = vmatpush.bf16.msra.mxu0 %v3536_v26  ;;  %3537 = vmatpush.bf16.msra.mxu1 %v3536_v26 }
 0x16e   :  { %v1881_v35 = vmax.f32 %v1734_v30, 0.0  ;;  %v3534_v30 = vld [vmem:[#allocation10 + $0x28] sm:$0xff] }
 0x172   :  { %v1771_v31 = vpop.f32.mrf.mxu2  ;;  %v1754_v51 = vpop.f32.mrf.mxu1 }
 0x173   :  { %v1735_v34 = vpop.f32.mrf.mxu0  ;;  %v1772_v2 = vadd.f32 %v1771_v31, %v1753_v25  ;;  %v1755_v3 = vadd.f32 %v1754_v51, %v347_v32  ;;  %v3533_v31 = vld [vmem:[#allocation10 + $0x20] sm:$0xff]  ;;  %v3531_v32 = vld [vmem:[#allocation10 + $0x10] sm:$0xff] }
 0x174   :  { %v1790_v47 = vpop.f32.mrf.mxu3  ;;  %v1736_v52 = vadd.f32 %v1735_v34, %v1717_v28  ;;  %v3535_v28 = vld [vmem:[#allocation10 + $0x30] sm:$0xff]  ;;  %v3530_v34 = vld [vmem:[#allocation10 + $0x8] sm:$0xff]  ;;  %v3529_v51 = vld [vmem:[#allocation10] sm:$0xff] }
 0x175   :  { %v1791_v6 = vadd.f32 %v1790_v47, %v1772_v2  ;;  %2306 = vmatpush.bf16.msra.mxu0 %v3535_v28  ;;  %3538 = vmatpush.bf16.msra.mxu1 %v3535_v28  ;;  %v3532_v47 = vld [vmem:[#allocation10 + $0x18] sm:$0xff] }
 0x176   :  { %v1885_v42 = vmax.f32 %v1736_v52, 0.0 }
 0x178   :  { %v1893_v50 = vpack.c.bf16 %v1885_v42, %v1881_v35 }
 0x179   :  { %2307 = vmatpush.bf16.msra.mxu0 %v3534_v30  ;;  %3539 = vmatpush.bf16.msra.mxu1 %v3534_v30 }
 0x17a   :  { %v1773_v37 = vpop.f32.mrf.mxu2  ;;  %2206 = vmatmul.bf16.gmra.mxu2 %v1893_v50  ;;  %v1823_v41 = vpop.f32.mrf.mxu1  ;;  %v3559_v50 = vld [vmem:[%s3938_s4] ss:$0 sm:$0xff] }
 0x17b   :  { %v1804_v59 = vpop.f32.mrf.mxu0  ;;  %v1774_v7 = vadd.f32 %v1773_v37, %v1755_v3 }
 0x17c   :  { %v1792_v53 = vpop.f32.mrf.mxu3  ;;  %v1805_v56 = vadd.f32 %v1804_v59, %v1786_v45 }
 0x17d   :  { %v1793_v16 = vadd.f32 %v1792_v53, %v1774_v7  ;;  %2308 = vmatpush.bf16.msra.mxu0 %v3533_v31  ;;  %3540 = vmatpush.bf16.msra.mxu1 %v3533_v31 }
 0x17e   :  { %v1824_v63 = vadd.f32 %v1823_v41, %v1805_v56 }
 0x181   :  { %2309 = vmatpush.bf16.msra.mxu0 %v3532_v47  ;;  %3541 = vmatpush.bf16.msra.mxu1 %v3532_v47 }
 0x182   :  { %v1842_v57 = vpop.f32.mrf.mxu2  ;;  %v1825_v61 = vpop.f32.mrf.mxu1 }
 0x183   :  { %v1806_v60 = vpop.f32.mrf.mxu0  ;;  %v1843_v49 = vadd.f32 %v1842_v57, %v1824_v63 }
 0x184   :  { %v1861_v5 = vpop.f32.mrf.mxu3  ;;  %v1807_v0 = vadd.f32 %v1806_v60, %v1788_v19 }
 0x185   :  { %v1862_v62 = vadd.f32 %v1861_v5, %v1843_v49  ;;  %2310 = vmatpush.bf16.msra.mxu0 %v3531_v32  ;;  %3542 = vmatpush.bf16.msra.mxu1 %v3531_v32 }
 0x186   :  { %v1826_v1 = vadd.f32 %v1825_v61, %v1807_v0 }
 0x187   :  { %v1874_v9 = vmax.f32 %v1862_v62, 0.0 }
 0x189   :  { %2311 = vmatpush.bf16.msra.mxu0 %v3530_v34  ;;  %3543 = vmatpush.bf16.msra.mxu1 %v3530_v34 }
 0x18a   :  { %v1844_v58 = vpop.f32.mrf.mxu2  ;;  %v1828_v4 = vpop.f32.mrf.mxu1 }
 0x18b   :  { %v1845_v38 = vadd.f32 %v1844_v58, %v1826_v1  ;;  %v1809_v23 = vpop.f32.mrf.mxu0 }
 0x18c   :  { %v1863_v33 = vpop.f32.mrf.mxu3  ;;  %v1810_v44 = vadd.f32 %v1809_v23, %v1791_v6 }
 0x18d   :  { %v1864_v39 = vadd.f32 %v1863_v33, %v1845_v38  ;;  %2312 = vmatpush.bf16.msra.mxu0 %v3529_v51  ;;  %3544 = vmatpush.bf16.msra.mxu1 %v3529_v51 }
 0x18e   :  { %v1829_v18 = vadd.f32 %v1828_v4, %v1810_v44 }
 0x18f   :  { %v1878_v8 = vmax.f32 %v1864_v39, 0.0 }
 0x191   :  { %v1890_v10 = vpack.c.bf16 %v1878_v8, %v1874_v9 }
 0x192   :  { %v1847_v13 = vpop.f32.mrf.mxu2  ;;  %v1830_v21 = vpop.f32.mrf.mxu1 }
 0x193   :  { %2220 = vmatmul.bf16.vlgmr.msrb.gmra.mxu3 %v1890_v10  ;;  %v1811_v17 = vpop.f32.mrf.mxu0  ;;  %v1848_v20 = vadd.f32 %v1847_v13, %v1829_v18  ;;  %v3560_v13 = vld [vmem:[%s3940_s6] ss:$0 sm:$0xff]  ;;  %s3725_s6 = smov 128  }
 0x194   :  { %v1866_v15 = vpop.f32.mrf.mxu3  ;;  %v1812_v11 = vadd.f32 %v1811_v17, %v1793_v16 }
 0x195   :  { %v1867_v55 = vadd.f32 %v1866_v15, %v1848_v20 }
 0x196   :  { %v1831_v22 = vadd.f32 %v1830_v21, %v1812_v11 }
 0x197   :  { %v1882_v48 = vmax.f32 %v1867_v55, 0.0 }
 0x19a   :  { %v1849_v24 = vpop.f32.mrf.mxu2 }
 0x19b   :  { %v1850_v14 = vadd.f32 %v1849_v24, %v1831_v22  ;;  %v2164_v52 = vpop.f32.mrf.mxu0 }
 0x19c   :  { %v1868_v46 = vpop.f32.mrf.mxu3  ;;  %v2165_v59 = vadd.f32 %v3559_v50, %v2164_v52 }
 0x19d   :  { %v1869_v27 = vadd.f32 %v1868_v46, %v1850_v14 }
 0x19f   :  { %v1886_v12 = vmax.f32 %v1869_v27, 0.0 }
 0x1a1   :  { %v1894_v54 = vpack.c.bf16 %v1886_v12, %v1882_v48 }
 0x1a3   :  { %2225 = vmatmul.bf16.gmra.mxu3 %v1894_v54  ;;  %v2166_v36 = vpop.f32.mrf.mxu0 }
 0x1a4   :  { %v2167_v41 = vadd.f32 %v3559_v50, %v2166_v36 }
 0x1a9   :  { %v2183_v35 = vpop.f32.mrf.mxu1 }
 0x1aa   :  { %v2184_v29 = vadd.f32 %v2183_v35, %v2165_v59 }
 0x1ab   :  { %v2169_v56 = vpop.f32.mrf.mxu0 }
 0x1ac   :  { %v2170_v33 = vadd.f32 %v3559_v50, %v2169_v56 }
 0x1b1   :  { %v2185_v37 = vpop.f32.mrf.mxu1 }
 0x1b2   :  { %v2186_v45 = vadd.f32 %v2185_v37, %v2167_v41 }
 0x1b3   :  { %v2171_v1 = vpop.f32.mrf.mxu0 }
 0x1b4   :  { %v2172_v62 = vadd.f32 %v3559_v50, %v2171_v1 }
 0x1b9   :  { %v2188_v19 = vpop.f32.mrf.mxu1 }
 0x1ba   :  { %v2189_v38 = vadd.f32 %v2188_v19, %v2170_v33 }
 0x1c1   :  { %v2190_v2 = vpop.f32.mrf.mxu1 }
 0x1c2   :  { %v2191_v3 = vadd.f32 %v2190_v2, %v2172_v62 }
 0x1ed   :  { %v2202_v42 = vpop.f32.mrf.mxu2 }
 0x1ee   :  { %v2203_v40 = vadd.f32 %v2202_v42, %v2184_v29 }
 0x1f5   :  { %v2204_v53 = vpop.f32.mrf.mxu2 }
 0x1f6   :  { %v2205_v57 = vadd.f32 %v2204_v53, %v2186_v45 }
 0x1fd   :  { %v2207_v63 = vpop.f32.mrf.mxu2 }
 0x1fe   :  { %v2208_v39 = vadd.f32 %v2207_v63, %v2189_v38 }
 0x205   :  { %v2209_v23 = vpop.f32.mrf.mxu2 }
 0x206   :  { %v2210_v4 = vadd.f32 %v2209_v23, %v2191_v3 }
 0x216   :  { %v2221_v43 = vpop.f32.mrf.mxu3 }
 0x217   :  { %v2222_v5 = vadd.f32 %v2221_v43, %v2203_v40 }
 0x219   :  { %v2231_v0 = vmax.f32 %v2222_v5, 0.0 }
 0x21e   :  { %v2223_v60 = vpop.f32.mrf.mxu3 }
 0x21f   :  { %v2224_v61 = vadd.f32 %v2223_v60, %v2205_v57 }
 0x221   :  { %v2232_v25 = vmax.f32 %v2224_v61, 0.0 }
 0x223   :  { %v2235_v49 = vpack.c.bf16 %v2232_v25, %v2231_v0 }
 0x225   :  { %2313 = vmatmul.bf16.vlgmr.msra.gmra.mxu0 %v2235_v49 }
 0x226   :  { %v2226_v58 = vpop.f32.mrf.mxu3 }
 0x227   :  { %v2227_v6 = vadd.f32 %v2226_v58, %v2208_v39 }
 0x229   :  { %v2233_v8 = vmax.f32 %v2227_v6, 0.0 }
 0x22e   :  { %v2228_v7 = vpop.f32.mrf.mxu3 }
 0x22f   :  { %v2229_v9 = vadd.f32 %v2228_v7, %v2210_v4 }
 0x231   :  { %v2234_v10 = vmax.f32 %v2229_v9, 0.0 }
 0x233   :  { %v2236_v44 = vpack.c.bf16 %v2234_v10, %v2233_v8 }
 0x235   :  { %2318 = vmatmul.bf16.vlgmr.msra.gmra.mxu1 %v2236_v44 }
 0x2a2   :  { %v2314_v15 = vpop.f32.mrf.mxu0 }
 0x2a3   :  { %v2315_v16 = vadd.f32 %v3560_v13, %v2314_v15 }
 0x2a5   :  { %2324 = vst [vmem:[#allocation11] sm:$0xff] %v2315_v16 }
 0x2aa   :  { %v2316_v17 = vpop.f32.mrf.mxu0 }
 0x2ab   :  { %v2317_v18 = vadd.f32 %v3560_v13, %v2316_v17 }
 0x2ad   :  { %2325 = vst [vmem:[#allocation11 + $0x8] sm:$0xff] %v2317_v18 }
 0x2b2   :  { %v2319_v11 = vpop.f32.mrf.mxu1 }
 0x2b3   :  { %v2320_v20 = vadd.f32 %v3560_v13, %v2319_v11 }
 0x2b5   :  { %2326 = vst [vmem:[#allocation11 + $0x10] sm:$0xff] %v2320_v20 }
 0x2ba   :  { %v2321_v21 = vpop.f32.mrf.mxu1 }
 0x2bb   :  { %v2322_v22 = vadd.f32 %v3560_v13, %v2321_v21 }
 0x2bd   :  { %2327 = vst [vmem:[#allocation11 + $0x18] sm:$0xff] %v2322_v22 }
 0x2be   :  { %2340 = dma.vmem_to_hbm [thread:$0]  %s2333_s8, 512, %s2335_s11, [#allocation4], %s3725_s6, %s3725_s6, %s3726_s12  }
 0x2bf   :  { %3711 = dma.done.wait [#allocation4], 512  }
 0x2c0   :  { %3712 = vsyncadd [#allocation4], 4294966784 }
 0x2c1   :  { %2345 = vsyncpa [#allocation3], 1 }
 0x2c2   :  { %2346 = vsyncpa [#allocation6], 1 }
 0x2c3   :  { %2347 = vsyncpa [#allocation9], 1 }
 0x2c4   :  { %2348 = vsyncpa [#allocation4], 1 }

</bundles_post_ra>
